<compile_context>
chip_gen: v7x
topology: tpu7x:2x2x1
jax: 0.10.0
libtpu: 0.0.40
codegen_flags: <defaults>
</compile_context>

<pallas_src>
import jax
import jax.numpy as jnp
import numpy as np
from jax.experimental import pallas as pl
from jax.experimental.pallas import tpu as pltpu


# ----------------------------- kernels --------------------------------------

def _mlp_kernel(x_ref, w1_ref, b1_ref, w2_ref, b2_ref, w3_ref, b3_ref, o_ref):
    # Compute dtype is baked into the prepared weights (bf16 or f32).  The x
    # tile arrives in its native dtype and is cast here (VPU work hidden under
    # the block DMA).  Matmuls accumulate in f32 on the MXU; bias add + tanh
    # run on the f32 accumulator (v5e has no bf16 VPU/EUP path).
    cdt = w1_ref.dtype
    xb = x_ref[...].astype(cdt)
    h = jnp.dot(xb, w1_ref[...], preferred_element_type=jnp.float32)
    h = jnp.tanh(h + b1_ref[...]).astype(cdt)
    h = jnp.dot(h, w2_ref[...], preferred_element_type=jnp.float32)
    h = jnp.tanh(h + b2_ref[...]).astype(cdt)
    y = jnp.dot(h, w3_ref[...], preferred_element_type=jnp.float32) + b3_ref[...]
    o_ref[...] = y.astype(o_ref.dtype)


def _linear_kernel(x_ref, w_ref, b_ref, o_ref):
    # hid_layer is None case: a single Linear layer.
    xb = x_ref[...].astype(w_ref.dtype)
    y = jnp.dot(xb, w_ref[...], preferred_element_type=jnp.float32) + b_ref[...]
    o_ref[...] = y.astype(o_ref.dtype)


# --------------------------- wrapper / specs ---------------------------------

def prepare_params(params, *, hid_layer=True, compute_dtype=jnp.bfloat16):
    """One-time parameter prep (hoisted off the per-call forward path).

    Weights are cast to the MXU compute dtype; biases are kept in f32 and
    reshaped to (1, out) so they broadcast over the batch tile.
    """
    def _w(a):
        return jnp.asarray(a, compute_dtype)

    def _b(a):
        return jnp.asarray(a, jnp.float32).reshape(1, -1)

    if hid_layer:
        return {
            "w1": _w(params["w1"]), "b1": _b(params["b1"]),
            "w2": _w(params["w2"]), "b2": _b(params["b2"]),
            "w3": _w(params["w3"]), "b3": _b(params["b3"]),
        }
    return {"w1": _w(params["w1"]), "b1": _b(params["b1"])}


def _const_spec(shape):
    # Constant (full-array) block: index map never moves -> single buffer.
    try:
        return pl.BlockSpec(shape, lambda i: (0, 0), pipeline_mode=pl.Buffered(1))
    except TypeError:  # older jax without pipeline_mode kwarg
        return pl.BlockSpec(shape, lambda i: (0, 0))


def _default_grid_steps():
    # v7x has 2 TensorCores per chip; everything earlier is 1 TC, where extra
    # grid steps are pure serial overhead.
    try:
        kind = getattr(jax.devices()[0], "device_kind", "") or ""
        if "v7" in kind.lower():
            return 2
    except Exception:
        pass
    return 1


def feed_forward_net(x, prepared_params, *, hid_layer=True, grid_steps=None):
    """FeedForwardNet forward pass as one fused Pallas TPU kernel.

    x: (batch, in_features), any float dtype (cast to compute dtype in-kernel).
    prepared_params: output of prepare_params() (weights already in compute
      dtype, biases f32 (1, out)).
    grid_steps: number of batch tiles.  None -> auto (1 on v5e/v6e, 2 on v7x
      when the batch splits evenly); falls back to 1 step otherwise.
    """
    out_dtype = x.dtype
    B, D_in = x.shape

    # Sublane granularity of the x tile in its *native* dtype.
    sub = max(1, int(8 * 4 // np.dtype(x.dtype).itemsize))

    steps = _default_grid_steps() if grid_steps is None else int(grid_steps)
    if steps > 1 and B % steps == 0 and (B // steps) % sub == 0:
        tb = B // steps
    else:
        # Single step: block batch dim == full array dim, so no (8,128)
        # divisibility requirement and no padding at all.
        tb, steps = B, 1
    grid = (steps,)

    x_spec = pl.BlockSpec((tb, D_in), lambda i: (i, 0))

    if hid_layer:
        p = prepared_params
        w1, b1, w2, b2, w3, b3 = p["w1"], p["b1"], p["w2"], p["b2"], p["w3"], p["b3"]
        H1, H2, D_out = w1.shape[1], w2.shape[1], w3.shape[1]

        return pl.pallas_call(
            _mlp_kernel,
            out_shape=jax.ShapeDtypeStruct((B, D_out), out_dtype),
            grid_spec=pltpu.PrefetchScalarGridSpec(
                num_scalar_prefetch=0,
                grid=grid,
                in_specs=[
                    x_spec,
                    _const_spec((D_in, H1)), _const_spec((1, H1)),
                    _const_spec((H1, H2)), _const_spec((1, H2)),
                    _const_spec((H2, D_out)), _const_spec((1, D_out)),
                ],
                out_specs=pl.BlockSpec((tb, D_out), lambda i: (i, 0)),
            ),
            compiler_params=pltpu.CompilerParams(
                dimension_semantics=("parallel",),
            ),
        )(x, w1, b1, w2, b2, w3, b3)

    else:
        p = prepared_params
        w1, b1 = p["w1"], p["b1"]
        D_out = w1.shape[1]

        return pl.pallas_call(
            _linear_kernel,
            out_shape=jax.ShapeDtypeStruct((B, D_out), out_dtype),
            grid_spec=pltpu.PrefetchScalarGridSpec(
                num_scalar_prefetch=0,
                grid=grid,
                in_specs=[
                    x_spec,
                    _const_spec((D_in, D_out)), _const_spec((1, D_out)),
                ],
                out_specs=pl.BlockSpec((tb, D_out), lambda i: (i, 0)),
            ),
            compiler_params=pltpu.CompilerParams(
                dimension_semantics=("parallel",),
            ),
        )(x, w1, b1)


# ------------------------------- test ----------------------------------------

def _init_linear(key, fan_in, fan_out, dtype=jnp.float32):
    # Mimic PyTorch nn.Linear default init: U(-1/sqrt(fan_in), 1/sqrt(fan_in)).
    kw, kb = jax.random.split(key)
    bound = 1.0 / np.sqrt(fan_in)
    w = jax.random.uniform(kw, (fan_in, fan_out), dtype, -bound, bound)
    b = jax.random.uniform(kb, (1, fan_out), dtype, -bound, bound)
    return w, b


def _reference_mlp(x, params):
    h = jnp.tanh(x @ params["w1"] + params["b1"])
    h = jnp.tanh(h @ params["w2"] + params["b2"])
    return h @ params["w3"] + params["b3"]


if __name__ == "__main__":
    key = jax.random.PRNGKey(0)
    kx, k1, k2, k3 = jax.random.split(key, 4)

    # Small model shapes: input=32, hid=[64, 48], out=16, batch=512.
    input_size, output_size = 32, 16
    hid = [64, 48]
    B = 512

    w1, b1 = _init_linear(k1, input_size, hid[0])
    w2, b2 = _init_linear(k2, hid[0], hid[1])
    w3, b3 = _init_linear(k3, hid[1], output_size)
    params = {"w1": w1, "b1": b1, "w2": w2, "b2": b2, "w3": w3, "b3": b3}

    x = jax.random.normal(kx, (B, input_size), dtype=jnp.float32)
    ref = jax.block_until_ready(_reference_mlp(x, params))

    # f32 compute path: tight check against the JAX reference.
    pf32 = prepare_params(params, hid_layer=True, compute_dtype=jnp.float32)
    out_f32 = jax.block_until_ready(feed_forward_net(x, pf32, hid_layer=True))
    np.testing.assert_allclose(np.asarray(out_f32), np.asarray(ref),
                               rtol=1e-5, atol=1e-5)

    # bf16 compute path (MXU-native on v6e/v7x): looser tolerance because
    # matmul inputs are rounded to bf16 (accumulation stays f32).
    pbf16 = prepare_params(params, hid_layer=True, compute_dtype=jnp.bfloat16)
    out_bf16 = jax.block_until_ready(feed_forward_net(x, pbf16, hid_layer=True))
    np.testing.assert_allclose(np.asarray(out_bf16), np.asarray(ref),
                               rtol=3e-2, atol=3e-2)

    # Explicit 2-step grid (v7x-style both-TC split) must also be correct.
    out_2 = jax.block_until_ready(
        feed_forward_net(x, pf32, hid_layer=True, grid_steps=2))
    np.testing.assert_allclose(np.asarray(out_2), np.asarray(ref),
                               rtol=1e-5, atol=1e-5)

    # hid_layer=None path: single Linear layer.
    plin = prepare_params({"w1": w1, "b1": b1}, hid_layer=False,
                          compute_dtype=jnp.float32)
    out_lin = jax.block_until_ready(feed_forward_net(x, plin, hid_layer=False))
    ref_lin = jax.block_until_ready(x @ w1 + b1)
    np.testing.assert_allclose(np.asarray(out_lin), np.asarray(ref_lin),
                               rtol=1e-5, atol=1e-5)

    print("KERNEL_OK")
</pallas_src>

<mosaic_0001>
module attributes {stable_mosaic.version = 11 : i64} {
  func.func @_mlp_kernel(%arg0: i32, %arg1: memref<512x32xf32, #tpu.memory_space<vmem>>, %arg2: memref<32x64xf32, #tpu.memory_space<vmem>>, %arg3: memref<1x64xf32, #tpu.memory_space<vmem>>, %arg4: memref<64x48xf32, #tpu.memory_space<vmem>>, %arg5: memref<1x48xf32, #tpu.memory_space<vmem>>, %arg6: memref<48x16xf32, #tpu.memory_space<vmem>>, %arg7: memref<1x16xf32, #tpu.memory_space<vmem>>, %arg8: memref<512x16xf32, #tpu.memory_space<vmem>>) attributes {dimension_semantics = [#tpu.dimension_semantics<parallel>], iteration_bounds = array<i64: 1>, scalar_prefetch = 0 : i64, scratch_operands = 0 : i64, tpu.core_type = #tpu.core_type<tc>, window_params = [{transform_indices = @transform_0, window_bounds = array<i64: 512, 32>}, {pipeline_mode = #tpu.pipeline_mode<synchronous>, transform_indices = @transform_1, window_bounds = array<i64: 32, 64>}, {pipeline_mode = #tpu.pipeline_mode<synchronous>, transform_indices = @transform_2, window_bounds = array<i64: 1, 64>}, {pipeline_mode = #tpu.pipeline_mode<synchronous>, transform_indices = @transform_3, window_bounds = array<i64: 64, 48>}, {pipeline_mode = #tpu.pipeline_mode<synchronous>, transform_indices = @transform_4, window_bounds = array<i64: 1, 48>}, {pipeline_mode = #tpu.pipeline_mode<synchronous>, transform_indices = @transform_5, window_bounds = array<i64: 48, 16>}, {pipeline_mode = #tpu.pipeline_mode<synchronous>, transform_indices = @transform_6, window_bounds = array<i64: 1, 16>}, {transform_indices = @transform_7, window_bounds = array<i64: 512, 16>}]} {
    %c0 = arith.constant 0 : index
    %c0_0 = arith.constant 0 : index
    %0 = vector.load %arg1[%c0, %c0_0] : memref<512x32xf32, #tpu.memory_space<vmem>>, vector<512x32xf32>
    %c0_1 = arith.constant 0 : index
    %c0_2 = arith.constant 0 : index
    %1 = vector.load %arg2[%c0_1, %c0_2] : memref<32x64xf32, #tpu.memory_space<vmem>>, vector<32x64xf32>
    %cst = arith.constant dense<0.000000e+00> : vector<512x64xf32>
    %2 = tpu.matmul %0, %1, %cst {dimension_numbers = #tpu.dot_dimension_numbers<[1], [0], [0], [1], [0, 0, 1, 1], [], []>} : vector<512x32xf32>, vector<32x64xf32>, vector<512x64xf32> -> vector<512x64xf32>
    %c0_3 = arith.constant 0 : index
    %c0_4 = arith.constant 0 : index
    %3 = vector.load %arg3[%c0_3, %c0_4] : memref<1x64xf32, #tpu.memory_space<vmem>>, vector<1x64xf32>
    %4 = vector.broadcast %3 : vector<1x64xf32> to vector<512x64xf32>
    %5 = arith.addf %2, %4 : vector<512x64xf32>
    %6 = math.tanh %5 : vector<512x64xf32>
    %c0_5 = arith.constant 0 : index
    %c0_6 = arith.constant 0 : index
    %7 = vector.load %arg4[%c0_5, %c0_6] : memref<64x48xf32, #tpu.memory_space<vmem>>, vector<64x48xf32>
    %cst_7 = arith.constant dense<0.000000e+00> : vector<512x48xf32>
    %8 = tpu.matmul %6, %7, %cst_7 {dimension_numbers = #tpu.dot_dimension_numbers<[1], [0], [0], [1], [0, 0, 1, 1], [], []>} : vector<512x64xf32>, vector<64x48xf32>, vector<512x48xf32> -> vector<512x48xf32>
    %c0_8 = arith.constant 0 : index
    %c0_9 = arith.constant 0 : index
    %9 = vector.load %arg5[%c0_8, %c0_9] : memref<1x48xf32, #tpu.memory_space<vmem>>, vector<1x48xf32>
    %10 = vector.broadcast %9 : vector<1x48xf32> to vector<512x48xf32>
    %11 = arith.addf %8, %10 : vector<512x48xf32>
    %12 = math.tanh %11 : vector<512x48xf32>
    %c0_10 = arith.constant 0 : index
    %c0_11 = arith.constant 0 : index
    %13 = vector.load %arg6[%c0_10, %c0_11] : memref<48x16xf32, #tpu.memory_space<vmem>>, vector<48x16xf32>
    %cst_12 = arith.constant dense<0.000000e+00> : vector<512x16xf32>
    %14 = tpu.matmul %12, %13, %cst_12 {dimension_numbers = #tpu.dot_dimension_numbers<[1], [0], [0], [1], [0, 0, 1, 1], [], []>} : vector<512x48xf32>, vector<48x16xf32>, vector<512x16xf32> -> vector<512x16xf32>
    %c0_13 = arith.constant 0 : index
    %c0_14 = arith.constant 0 : index
    %15 = vector.load %arg7[%c0_13, %c0_14] : memref<1x16xf32, #tpu.memory_space<vmem>>, vector<1x16xf32>
    %16 = vector.broadcast %15 : vector<1x16xf32> to vector<512x16xf32>
    %17 = arith.addf %14, %16 : vector<512x16xf32>
    %c0_15 = arith.constant 0 : index
    %c0_16 = arith.constant 0 : index
    %18 = vector.load %arg8[%c0_15, %c0_16] : memref<512x16xf32, #tpu.memory_space<vmem>>, vector<512x16xf32>
    tpu.vector_store %arg8[%c0_15, %c0_16], %17 {strides = array<i32>} : memref<512x16xf32, #tpu.memory_space<vmem>>, vector<512x16xf32>,
    return
  }
  func.func @transform_0(%arg0: i32) -> (i32, i32) {
    %c0_i32 = arith.constant 0 : i32
    %c0_i32_0 = arith.constant 0 : i32
    return %arg0, %c0_i32 : i32, i32
  }
  func.func @transform_1(%arg0: i32) -> (i32, i32) {
    %c0_i32 = arith.constant 0 : i32
    %c0_i32_0 = arith.constant 0 : i32
    %c0_i32_1 = arith.constant 0 : i32
    return %c0_i32, %c0_i32_0 : i32, i32
  }
  func.func @transform_2(%arg0: i32) -> (i32, i32) {
    %c0_i32 = arith.constant 0 : i32
    %c0_i32_0 = arith.constant 0 : i32
    %c0_i32_1 = arith.constant 0 : i32
    return %c0_i32, %c0_i32_0 : i32, i32
  }
  func.func @transform_3(%arg0: i32) -> (i32, i32) {
    %c0_i32 = arith.constant 0 : i32
    %c0_i32_0 = arith.constant 0 : i32
    %c0_i32_1 = arith.constant 0 : i32
    return %c0_i32, %c0_i32_0 : i32, i32
  }
  func.func @transform_4(%arg0: i32) -> (i32, i32) {
    %c0_i32 = arith.constant 0 : i32
    %c0_i32_0 = arith.constant 0 : i32
    %c0_i32_1 = arith.constant 0 : i32
    return %c0_i32, %c0_i32_0 : i32, i32
  }
  func.func @transform_5(%arg0: i32) -> (i32, i32) {
    %c0_i32 = arith.constant 0 : i32
    %c0_i32_0 = arith.constant 0 : i32
    %c0_i32_1 = arith.constant 0 : i32
    return %c0_i32, %c0_i32_0 : i32, i32
  }
  func.func @transform_6(%arg0: i32) -> (i32, i32) {
    %c0_i32 = arith.constant 0 : i32
    %c0_i32_0 = arith.constant 0 : i32
    %c0_i32_1 = arith.constant 0 : i32
    return %c0_i32, %c0_i32_0 : i32, i32
  }
  func.func @transform_7(%arg0: i32) -> (i32, i32) {
    %c0_i32 = arith.constant 0 : i32
    %c0_i32_0 = arith.constant 0 : i32
    return %arg0, %c0_i32 : i32, i32
  }
}

</mosaic_0001>

<bundles_post_ra>
// kernel: tpu_custom_call.1
= control target key start
LH: loop header
LB: loop body
LE: loop exit
PB: predicated region body
PF: predicated region fallthrough
CT: control target
= control target key end

     0   :  { %vm101_vm0 = vcmask 261120   ;;  %vm758_vm1 = vcmask 523264   ;;  %vm1413_vm2 = vcmask 392192   ;;  %vm1991_vm3 = vcmask 130048   ;;  %s4122_s1 = inlined_call_operand.vmem [shape: f32[32,64], index: 1, kind: input, shape index: {}]   ;;  %s4123_s0 = inlined_call_operand.vmem [shape: f32[512,32], index: 0, kind: input, shape index: {}]   ;;  %s4124_s3 = inlined_call_operand.vmem [shape: f32[64,48], index: 3, kind: input, shape index: {}]   ;;  %s4125_s2 = inlined_call_operand.vmem [shape: f32[1,64], index: 2, kind: input, shape index: {}]   ;;  %s4126_s5 = inlined_call_operand.vmem [shape: f32[48,16], index: 5, kind: input, shape index: {}]   ;;  %s4127_s4 = inlined_call_operand.vmem [shape: f32[1,48], index: 4, kind: input, shape index: {}]   ;;  %s4128_s6 = inlined_call_operand.vmem [shape: f32[1,16], index: 6, kind: input, shape index: {}]   ;;  %s4129_s7 = inlined_call_operand.vmem [shape: f32[512,16], index: 7, kind: output, shape index: {}]  }
   0x1   :  { %v90_v0 = vld [vmem:[%s4122_s1] sm:$0xff]  ;;  %v91_v1 = vld [vmem:[%s4122_s1 + $0x8] sm:$0xff]  ;;  %v92_v2 = vld [vmem:[%s4122_s1 + $0x10] sm:$0xff] }
   0x2   :  { %v2789_v3 = vpack.c.bf16 %v91_v1, %v90_v0  ;;  %v93_v4 = vld [vmem:[%s4122_s1 + $0x18] sm:$0xff]  ;;  %v26_v5 = vld [vmem:[%s4123_s0] sm:$0xff]  ;;  %v27_v7 = vld [vmem:[%s4123_s0 + $0x8] sm:$0xff] }
   0x3   :  { %v2793_v6 = vpack.c.bf16 %v93_v4, %v92_v2  ;;  %2473 = vmatprep.mubr.msk.f32.mxu0 %vm101_vm0, %v26_v5  ;;  %v28_v8 = vld [vmem:[%s4123_s0 + $0x10] sm:$0xff]  ;;  %v29_v9 = vld [vmem:[%s4123_s0 + $0x18] sm:$0xff]  ;;  %v58_v10 = vld [vmem:[%s4123_s0 + $0x100] sm:$0xff] }
   0x4   :  { %2790 = vmatprep.subr.bf16.mxu0 %v2789_v3  ;;  %2825 = vmatprep.subr.bf16.mxu1 %v2789_v3  ;;  %v59_v11 = vld [vmem:[%s4123_s0 + $0x108] sm:$0xff]  ;;  %v60_v12 = vld [vmem:[%s4123_s0 + $0x110] sm:$0xff]  ;;  %v30_v13 = vld [vmem:[%s4123_s0 + $0x20] sm:$0xff] }
   0x5   :  { %2792 = vmatpush3.bf16.msra.mxu0 %v2789_v3  ;;  %2827 = vmatpush3.bf16.msra.mxu1 %v2789_v3  ;;  %v61_v14 = vld [vmem:[%s4123_s0 + $0x118] sm:$0xff]  ;;  %v31_v15 = vld [vmem:[%s4123_s0 + $0x28] sm:$0xff]  ;;  %v62_v16 = vld [vmem:[%s4123_s0 + $0x120] sm:$0xff] }
   0x6   :  { %2794 = vmatprep.subr.bf16.mxu0 %v2793_v6  ;;  %2826 = vmatprep.subr.bf16.mxu1 %v2793_v6  ;;  %v32_v17 = vld [vmem:[%s4123_s0 + $0x30] sm:$0xff]  ;;  %v63_v18 = vld [vmem:[%s4123_s0 + $0x128] sm:$0xff]  ;;  %v33_v19 = vld [vmem:[%s4123_s0 + $0x38] sm:$0xff] }
   0x7   :  { %2521 = vmatprep.mubr.msk.f32.mxu1 %vm101_vm0, %v58_v10  ;;  %v64_v20 = vld [vmem:[%s4123_s0 + $0x130] sm:$0xff]  ;;  %v34_v21 = vld [vmem:[%s4123_s0 + $0x40] sm:$0xff]  ;;  %v65_v22 = vld [vmem:[%s4123_s0 + $0x138] sm:$0xff] }
   0x8   :  { %v743_v23 = vld [vmem:[%s4124_s3] sm:$0xff]  ;;  %v744_v24 = vld [vmem:[%s4124_s3 + $0x8] sm:$0xff]  ;;  %v745_v25 = vld [vmem:[%s4124_s3 + $0x10] sm:$0xff] }
   0x9   :  { %2796 = vmatpush3.bf16.msra.mxu0 %v2793_v6  ;;  %2828 = vmatpush3.bf16.msra.mxu1 %v2793_v6  ;;  %v746_v26 = vld [vmem:[%s4124_s3 + $0x18] sm:$0xff]  ;;  %v35_v27 = vld [vmem:[%s4123_s0 + $0x48] sm:$0xff]  ;;  %v66_v28 = vld [vmem:[%s4123_s0 + $0x140] sm:$0xff]  ;;  %v2797_v29 = vpack.c.bf16 %v744_v24, %v743_v23 }
   0xa   :  { %v36_v30 = vld [vmem:[%s4123_s0 + $0x50] sm:$0xff]  ;;  %v2801_v31 = vpack.c.bf16 %v746_v26, %v745_v25  ;;  %v747_v32 = vld [vmem:[%s4124_s3 + $0x20] sm:$0xff]  ;;  %v748_v33 = vld [vmem:[%s4124_s3 + $0x28] sm:$0xff] }
   0xb   :  { %2798 = vmatprep.subr.bf16.mxu1 %v2797_v29  ;;  %v67_v34 = vld [vmem:[%s4123_s0 + $0x148] sm:$0xff]  ;;  %v37_v35 = vld [vmem:[%s4123_s0 + $0x58] sm:$0xff]  ;;  %v68_v36 = vld [vmem:[%s4123_s0 + $0x150] sm:$0xff]  ;;  %v2805_v38 = vpack.c.bf16 %v748_v33, %v747_v32 }
   0xc   :  { %2474 = vmatmul.mubr.msk.f32.vlgmr.msra.gmra.mrb[0].mxu0 %vm101_vm0, %v27_v7  ;;  %2522 = vmatmul.mubr.msk.f32.vlgmr.msra.gmra.mrb[0].mxu1 %vm101_vm0, %v59_v11  ;;  %v38_v37 = vld [vmem:[%s4123_s0 + $0x60] sm:$0xff]  ;;  %v749_v39 = vld [vmem:[%s4124_s3 + $0x30] sm:$0xff]  ;;  %v750_v40 = vld [vmem:[%s4124_s3 + $0x38] sm:$0xff] }
   0xd   :  { %2476 = vmatprep.mubr.msk.f32.mxu0 %vm101_vm0, %v28_v8  ;;  %2524 = vmatprep.mubr.msk.f32.mxu1 %vm101_vm0, %v60_v12  ;;  %v69_v41 = vld [vmem:[%s4123_s0 + $0x158] sm:$0xff]  ;;  %v39_v42 = vld [vmem:[%s4123_s0 + $0x68] sm:$0xff]  ;;  %v70_v43 = vld [vmem:[%s4123_s0 + $0x160] sm:$0xff]  ;;  %v2809_v45 = vpack.c.bf16 %v750_v40, %v749_v39 }
   0xe   :  { %2800 = vmatpush3.bf16.msra.mxu1 %v2797_v29  ;;  %v40_v44 = vld [vmem:[%s4123_s0 + $0x70] sm:$0xff]  ;;  %v71_v46 = vld [vmem:[%s4123_s0 + $0x168] sm:$0xff]  ;;  %v41_v47 = vld [vmem:[%s4123_s0 + $0x78] sm:$0xff] }
   0xf   :  { %2802 = vmatprep.subr.bf16.mxu1 %v2801_v31  ;;  %v72_v48 = vld [vmem:[%s4123_s0 + $0x170] sm:$0xff]  ;;  %v42_v49 = vld [vmem:[%s4123_s0 + $0x80] sm:$0xff]  ;;  %v73_v50 = vld [vmem:[%s4123_s0 + $0x178] sm:$0xff] }
  0x10   :  { %2477 = vmatmul.mubr.msk.f32.gmra.mrb[2].mxu0 %vm101_vm0, %v29_v9  ;;  %2525 = vmatmul.mubr.msk.f32.gmra.mrb[2].mxu1 %vm101_vm0, %v61_v14  ;;  %v43_v51 = vld [vmem:[%s4123_s0 + $0x88] sm:$0xff]  ;;  %v74_v52 = vld [vmem:[%s4123_s0 + $0x180] sm:$0xff]  ;;  %v44_v53 = vld [vmem:[%s4123_s0 + $0x90] sm:$0xff] }
  0x11   :  { %2479 = vmatprep.mubr.msk.f32.mxu0 %vm101_vm0, %v30_v13  ;;  %2527 = vmatprep.mubr.msk.f32.mxu1 %vm101_vm0, %v62_v16  ;;  %v75_v54 = vld [vmem:[%s4123_s0 + $0x188] sm:$0xff]  ;;  %v45_v55 = vld [vmem:[%s4123_s0 + $0x98] sm:$0xff]  ;;  %v76_v56 = vld [vmem:[%s4123_s0 + $0x190] sm:$0xff] }
  0x12   :  { %2804 = vmatpush3.bf16.msra.mxu1 %v2801_v31  ;;  %v46_v57 = vld [vmem:[%s4123_s0 + $0xa0] sm:$0xff]  ;;  %v77_v58 = vld [vmem:[%s4123_s0 + $0x198] sm:$0xff]  ;;  %v47_v59 = vld [vmem:[%s4123_s0 + $0xa8] sm:$0xff] }
  0x13   :  { %2806 = vmatprep.subr.bf16.mxu1 %v2805_v38  ;;  %v78_v60 = vld [vmem:[%s4123_s0 + $0x1a0] sm:$0xff]  ;;  %v48_v61 = vld [vmem:[%s4123_s0 + $0xb0] sm:$0xff]  ;;  %v79_v62 = vld [vmem:[%s4123_s0 + $0x1a8] sm:$0xff] }
  0x14   :  { %2480 = vmatmul.mubr.msk.f32.gmra.mrb[4].mxu0 %vm101_vm0, %v31_v15  ;;  %2528 = vmatmul.mubr.msk.f32.gmra.mrb[4].mxu1 %vm101_vm0, %v63_v18  ;;  %v49_v63 = vld [vmem:[%s4123_s0 + $0xb8] sm:$0xff]  ;;  %v80_v0 = vld [vmem:[%s4123_s0 + $0x1b0] sm:$0xff]  ;;  %v50_v1 = vld [vmem:[%s4123_s0 + $0xc0] sm:$0xff] }
  0x15   :  { %2482 = vmatprep.mubr.msk.f32.mxu0 %vm101_vm0, %v32_v17  ;;  %2530 = vmatprep.mubr.msk.f32.mxu1 %vm101_vm0, %v64_v20  ;;  %v81_v2 = vld [vmem:[%s4123_s0 + $0x1b8] sm:$0xff]  ;;  %v51_v3 = vld [vmem:[%s4123_s0 + $0xc8] sm:$0xff]  ;;  %v82_v4 = vld [vmem:[%s4123_s0 + $0x1c0] sm:$0xff] }
  0x16   :  { %2808 = vmatpush3.bf16.msra.mxu1 %v2805_v38  ;;  %v52_v5 = vld [vmem:[%s4123_s0 + $0xd0] sm:$0xff]  ;;  %v83_v6 = vld [vmem:[%s4123_s0 + $0x1c8] sm:$0xff]  ;;  %v53_v7 = vld [vmem:[%s4123_s0 + $0xd8] sm:$0xff] }
  0x17   :  { %2810 = vmatprep.subr.bf16.mxu1 %v2809_v45  ;;  %v84_v8 = vld [vmem:[%s4123_s0 + $0x1d0] sm:$0xff]  ;;  %v54_v9 = vld [vmem:[%s4123_s0 + $0xe0] sm:$0xff]  ;;  %v85_v10 = vld [vmem:[%s4123_s0 + $0x1d8] sm:$0xff] }
  0x18   :  { %2483 = vmatmul.mubr.msk.f32.gmra.mrb[6].mxu0 %vm101_vm0, %v33_v19  ;;  %2531 = vmatmul.mubr.msk.f32.gmra.mrb[6].mxu1 %vm101_vm0, %v65_v22  ;;  %v55_v11 = vld [vmem:[%s4123_s0 + $0xe8] sm:$0xff]  ;;  %v86_v12 = vld [vmem:[%s4123_s0 + $0x1e0] sm:$0xff]  ;;  %v56_v13 = vld [vmem:[%s4123_s0 + $0xf0] sm:$0xff] }
  0x19   :  { %2485 = vmatprep.mubr.msk.f32.mxu0 %vm101_vm0, %v34_v21  ;;  %2533 = vmatprep.mubr.msk.f32.mxu1 %vm101_vm0, %v66_v28  ;;  %v87_v14 = vld [vmem:[%s4123_s0 + $0x1e8] sm:$0xff]  ;;  %v57_v15 = vld [vmem:[%s4123_s0 + $0xf8] sm:$0xff]  ;;  %v88_v16 = vld [vmem:[%s4123_s0 + $0x1f0] sm:$0xff] }
  0x1a   :  { %2812 = vmatpush3.bf16.msra.mxu1 %v2809_v45  ;;  %v89_v17 = vld [vmem:[%s4123_s0 + $0x1f8] sm:$0xff]  ;;  %v3420_v18 = vld [vmem:[%s4125_s2] ss:$0 sm:$0xff] }
  0x1b   :  { %v1400_v45 = vld [vmem:[%s4126_s5] sm:$0xff] }
  0x1c   :  { %2486 = vmatmul.mubr.msk.f32.gmra.mrb[8].mxu0 %vm101_vm0, %v35_v27  ;;  %2534 = vmatmul.mubr.msk.f32.gmra.mrb[8].mxu1 %vm101_vm0, %v67_v34 }
  0x1d   :  { %2488 = vmatprep.mubr.msk.f32.mxu0 %vm101_vm0, %v36_v30  ;;  %2536 = vmatprep.mubr.msk.f32.mxu1 %vm101_vm0, %v68_v36 }
  0x20   :  { %2489 = vmatmul.mubr.msk.f32.gmra.mrb[10].mxu0 %vm101_vm0, %v37_v35  ;;  %2537 = vmatmul.mubr.msk.f32.gmra.mrb[10].mxu1 %vm101_vm0, %v69_v41 }
  0x21   :  { %2491 = vmatprep.mubr.msk.f32.mxu0 %vm101_vm0, %v38_v37  ;;  %2539 = vmatprep.mubr.msk.f32.mxu1 %vm101_vm0, %v70_v43 }
  0x24   :  { %2492 = vmatmul.mubr.msk.f32.gmra.mrb[12].mxu0 %vm101_vm0, %v39_v42  ;;  %2540 = vmatmul.mubr.msk.f32.gmra.mrb[12].mxu1 %vm101_vm0, %v71_v46  ;;  %v1401_v46 = vld [vmem:[%s4126_s5 + $0x8] sm:$0xff] }
  0x25   :  { %2494 = vmatprep.mubr.msk.f32.mxu0 %vm101_vm0, %v40_v44  ;;  %2542 = vmatprep.mubr.msk.f32.mxu1 %vm101_vm0, %v72_v48 }
  0x28   :  { %2495 = vmatmul.mubr.msk.f32.gmra.mrb[14].mxu0 %vm101_vm0, %v41_v47  ;;  %2543 = vmatmul.mubr.msk.f32.gmra.mrb[14].mxu1 %vm101_vm0, %v73_v50  ;;  %v1402_v47 = vld [vmem:[%s4126_s5 + $0x10] sm:$0xff]  ;;  %v2813_v50 = vpack.c.bf16 %v1401_v46, %v1400_v45 }
  0x29   :  { %2497 = vmatprep.mubr.msk.f32.mxu0 %vm101_vm0, %v42_v49  ;;  %2545 = vmatprep.mubr.msk.f32.mxu1 %vm101_vm0, %v74_v52 }
  0x2a   :  { %2814 = vmatprep.subr.bf16.mxu0 %v2813_v50 }
  0x2b   :  { %2816 = vmatpush3.bf16.msra.mxu0 %v2813_v50 }
  0x2c   :  { %2498 = vmatmul.mubr.msk.f32.gmra.mrb[16].mxu0 %vm101_vm0, %v43_v51  ;;  %2546 = vmatmul.mubr.msk.f32.gmra.mrb[16].mxu1 %vm101_vm0, %v75_v54  ;;  %v1403_v51 = vld [vmem:[%s4126_s5 + $0x18] sm:$0xff] }
  0x2d   :  { %2500 = vmatprep.mubr.msk.f32.mxu0 %vm101_vm0, %v44_v53  ;;  %2548 = vmatprep.mubr.msk.f32.mxu1 %vm101_vm0, %v76_v56  ;;  %v2817_v54 = vpack.c.bf16 %v1403_v51, %v1402_v47  ;;  %v1405_v56 = vld [vmem:[%s4126_s5 + $0x28] sm:$0xff] }
  0x2f   :  { %2818 = vmatprep.subr.bf16.mxu0 %v2817_v54 }
  0x30   :  { %2501 = vmatmul.mubr.msk.f32.gmra.mrb[18].mxu0 %vm101_vm0, %v45_v55  ;;  %2549 = vmatmul.mubr.msk.f32.gmra.mrb[18].mxu1 %vm101_vm0, %v77_v58  ;;  %v1404_v55 = vld [vmem:[%s4126_s5 + $0x20] sm:$0xff] }
  0x31   :  { %2503 = vmatprep.mubr.msk.f32.mxu0 %vm101_vm0, %v46_v57  ;;  %2551 = vmatprep.mubr.msk.f32.mxu1 %vm101_vm0, %v78_v60 }
  0x32   :  { %2820 = vmatpush3.bf16.msra.mxu0 %v2817_v54 }
  0x34   :  { %2504 = vmatmul.mubr.msk.f32.gmra.mrb[20].mxu0 %vm101_vm0, %v47_v59  ;;  %2552 = vmatmul.mubr.msk.f32.gmra.mrb[20].mxu1 %vm101_vm0, %v79_v62 }
  0x35   :  { %2506 = vmatprep.mubr.msk.f32.mxu0 %vm101_vm0, %v48_v61  ;;  %2554 = vmatprep.mubr.msk.f32.mxu1 %vm101_vm0, %v80_v0 }
  0x38   :  { %2507 = vmatmul.mubr.msk.f32.gmra.mrb[22].mxu0 %vm101_vm0, %v49_v63  ;;  %2555 = vmatmul.mubr.msk.f32.gmra.mrb[22].mxu1 %vm101_vm0, %v81_v2 }
  0x39   :  { %2509 = vmatprep.mubr.msk.f32.mxu0 %vm101_vm0, %v50_v1  ;;  %2557 = vmatprep.mubr.msk.f32.mxu1 %vm101_vm0, %v82_v4  ;;  %v2821_v1 = vpack.c.bf16 %v1405_v56, %v1404_v55 }
  0x3b   :  { %2822 = vmatprep.subr.bf16.mxu0 %v2821_v1 }
  0x3c   :  { %2510 = vmatmul.mubr.msk.f32.gmra.mrb[24].mxu0 %vm101_vm0, %v51_v3  ;;  %2558 = vmatmul.mubr.msk.f32.gmra.mrb[24].mxu1 %vm101_vm0, %v83_v6 }
  0x3d   :  { %2512 = vmatprep.mubr.msk.f32.mxu0 %vm101_vm0, %v52_v5  ;;  %2560 = vmatprep.mubr.msk.f32.mxu1 %vm101_vm0, %v84_v8 }
  0x3e   :  { %2824 = vmatpush3.bf16.msra.mxu0 %v2821_v1 }
  0x40   :  { %2513 = vmatmul.mubr.msk.f32.gmra.mrb[26].mxu0 %vm101_vm0, %v53_v7  ;;  %2561 = vmatmul.mubr.msk.f32.gmra.mrb[26].mxu1 %vm101_vm0, %v85_v10 }
  0x41   :  { %2515 = vmatprep.mubr.msk.f32.mxu0 %vm101_vm0, %v54_v9  ;;  %2563 = vmatprep.mubr.msk.f32.mxu1 %vm101_vm0, %v86_v12 }
  0x44   :  { %2516 = vmatmul.mubr.msk.f32.gmra.mrb[28].mxu0 %vm101_vm0, %v55_v11  ;;  %2564 = vmatmul.mubr.msk.f32.gmra.mrb[28].mxu1 %vm101_vm0, %v87_v14 }
  0x45   :  { %2518 = vmatprep.mubr.msk.f32.mxu0 %vm101_vm0, %v56_v13  ;;  %2566 = vmatprep.mubr.msk.f32.mxu1 %vm101_vm0, %v88_v16 }
  0x48   :  { %2519 = vmatmul.mubr.msk.f32.gmra.mrb[30].mxu0 %vm101_vm0, %v57_v15  ;;  %2567 = vmatmul.mubr.msk.f32.gmra.mrb[30].mxu1 %vm101_vm0, %v89_v17 }
  0xdf   :  { %v2475_v19 = vpop.f32.mrb[0].mxu0  ;;  %v2523_v23 = vpop.f32.mrb[0].mxu1 }
  0xe0   :  { %v366_v20 = vadd.f32 %v2475_v19, %v3420_v18  ;;  %v360_v21 = vpop.f32.mrb[1].mxu0  ;;  %v3425_v25 = vadd.f32 %v2523_v23, %v3420_v18  ;;  %v3427_v26 = vpop.f32.mrb[1].mxu1 }
  0xe1   :  { %v361_v22 = vadd.f32 %v3420_v18, %v360_v21 }
  0xe3   :  { %2829 = vtanh.f32 %v361_v22  ;;  %v2478_v24 = vpop.f32.mrb[2].mxu0  ;;  %v2526_v30 = vpop.f32.mrb[2].mxu1 }
  0xe4   :  { %2831 = vtanh.f32 %v366_v20  ;;  %v376_v27 = vadd.f32 %v2478_v24, %v3420_v18  ;;  %v370_v28 = vpop.f32.mrb[3].mxu0  ;;  %v3432_v32 = vadd.f32 %v2526_v30, %v3420_v18  ;;  %v530_v33 = vpop.f32.mrb[3].mxu1 }
  0xe5   :  { %v371_v29 = vadd.f32 %v3420_v18, %v370_v28  ;;  %v3436_v36 = vadd.f32 %v3420_v18, %v530_v33 }
  0xe7   :  { %2833 = vtanh.f32 %v371_v29  ;;  %v2481_v31 = vpop.f32.mrb[4].mxu0  ;;  %v2529_v38 = vpop.f32.mrb[4].mxu1 }
  0xe8   :  { %2835 = vtanh.f32 %v376_v27  ;;  %v386_v34 = vadd.f32 %v2481_v31, %v3420_v18  ;;  %v380_v35 = vpop.f32.mrb[5].mxu0  ;;  %v3440_v40 = vadd.f32 %v2529_v38, %v3420_v18  ;;  %v540_v41 = vpop.f32.mrb[5].mxu1 }
  0xe9   :  { %v381_v37 = vadd.f32 %v3420_v18, %v380_v35  ;;  %v3444_v44 = vadd.f32 %v3420_v18, %v540_v41 }
  0xeb   :  { %2837 = vtanh.f32 %v381_v37  ;;  %v2484_v39 = vpop.f32.mrb[6].mxu0  ;;  %v2532_v53 = vpop.f32.mrb[6].mxu1 }
  0xec   :  { %2839 = vtanh.f32 %v386_v34  ;;  %v396_v42 = vadd.f32 %v2484_v39, %v3420_v18  ;;  %v390_v43 = vpop.f32.mrb[7].mxu0  ;;  %v3468_v58 = vadd.f32 %v2532_v53, %v3420_v18  ;;  %v550_v59 = vpop.f32.mrb[7].mxu1 }
  0xed   :  { %v2830_v48 = vpop.eup %2829  ;;  %v391_v49 = vadd.f32 %v3420_v18, %v390_v43  ;;  %v3472_v62 = vadd.f32 %v3420_v18, %v550_v59 }
  0xee   :  { %v2832_v52 = vpop.eup %2831  ;;  %2585 = vmatprep.mubr.msk.f32.mxu1 %vm758_vm1, %v2830_v48 }
  0xef   :  { %2841 = vtanh.f32 %v391_v49  ;;  %v2487_v57 = vpop.f32.mrb[8].mxu0  ;;  %2586 = vmatmul.mubr.msk.f32.vlgmr.msra.gmra.mrb[32].mxu1 %vm758_vm1, %v2832_v52  ;;  %v2535_v3 = vpop.f32.mrb[8].mxu1 }
  0xf0   :  { %2843 = vtanh.f32 %v396_v42  ;;  %v406_v60 = vadd.f32 %v2487_v57, %v3420_v18  ;;  %v400_v61 = vpop.f32.mrb[9].mxu0  ;;  %v3478_v5 = vadd.f32 %v2535_v3, %v3420_v18  ;;  %v560_v6 = vpop.f32.mrb[9].mxu1 }
  0xf1   :  { %v2834_v63 = vpop.eup %2833  ;;  %v401_v0 = vadd.f32 %v3420_v18, %v400_v61  ;;  %v3482_v9 = vadd.f32 %v3420_v18, %v560_v6 }
  0xf2   :  { %v2836_v2 = vpop.eup %2835  ;;  %2588 = vmatprep.mubr.msk.f32.mxu1 %vm758_vm1, %v2834_v63 }
  0xf3   :  { %2845 = vtanh.f32 %v401_v0  ;;  %v2490_v4 = vpop.f32.mrb[10].mxu0  ;;  %2589 = vmatmul.mubr.msk.f32.gmra.mrb[34].mxu1 %vm758_vm1, %v2836_v2  ;;  %v2538_v13 = vpop.f32.mrb[10].mxu1 }
  0xf4   :  { %2847 = vtanh.f32 %v406_v60  ;;  %v416_v7 = vadd.f32 %v2490_v4, %v3420_v18  ;;  %v410_v8 = vpop.f32.mrb[11].mxu0  ;;  %v3488_v15 = vadd.f32 %v2538_v13, %v3420_v18  ;;  %v570_v16 = vpop.f32.mrb[11].mxu1 }
  0xf5   :  { %v2838_v10 = vpop.eup %2837  ;;  %v411_v11 = vadd.f32 %v3420_v18, %v410_v8  ;;  %v3492_v20 = vadd.f32 %v3420_v18, %v570_v16 }
  0xf6   :  { %v2840_v12 = vpop.eup %2839  ;;  %2591 = vmatprep.mubr.msk.f32.mxu1 %vm758_vm1, %v2838_v10 }
  0xf7   :  { %2849 = vtanh.f32 %v411_v11  ;;  %v2493_v14 = vpop.f32.mrb[12].mxu0  ;;  %2592 = vmatmul.mubr.msk.f32.gmra.mrb[36].mxu1 %vm758_vm1, %v2840_v12  ;;  %v2541_v24 = vpop.f32.mrb[12].mxu1 }
  0xf8   :  { %2851 = vtanh.f32 %v416_v7  ;;  %v426_v17 = vadd.f32 %v2493_v14, %v3420_v18  ;;  %v420_v19 = vpop.f32.mrb[13].mxu0  ;;  %v3498_v28 = vadd.f32 %v2541_v24, %v3420_v18  ;;  %v580_v29 = vpop.f32.mrb[13].mxu1 }
  0xf9   :  { %v2842_v21 = vpop.eup %2841  ;;  %v421_v22 = vadd.f32 %v3420_v18, %v420_v19  ;;  %v3502_v33 = vadd.f32 %v3420_v18, %v580_v29 }
  0xfa   :  { %v2844_v23 = vpop.eup %2843  ;;  %2594 = vmatprep.mubr.msk.f32.mxu1 %vm758_vm1, %v2842_v21 }
  0xfb   :  { %2853 = vtanh.f32 %v421_v22  ;;  %v2496_v27 = vpop.f32.mrb[14].mxu0  ;;  %2595 = vmatmul.mubr.msk.f32.gmra.mrb[38].mxu1 %vm758_vm1, %v2844_v23  ;;  %v2544_v38 = vpop.f32.mrb[14].mxu1 }
  0xfc   :  { %2855 = vtanh.f32 %v426_v17  ;;  %v436_v30 = vadd.f32 %v2496_v27, %v3420_v18  ;;  %v430_v31 = vpop.f32.mrb[15].mxu0  ;;  %v3508_v41 = vadd.f32 %v2544_v38, %v3420_v18  ;;  %v590_v42 = vpop.f32.mrb[15].mxu1 }
  0xfd   :  { %v2846_v34 = vpop.eup %2845  ;;  %v431_v35 = vadd.f32 %v3420_v18, %v430_v31  ;;  %v3512_v46 = vadd.f32 %v3420_v18, %v590_v42 }
  0xfe   :  { %v2848_v37 = vpop.eup %2847  ;;  %2597 = vmatprep.mubr.msk.f32.mxu1 %vm758_vm1, %v2846_v34 }
  0xff   :  { %2857 = vtanh.f32 %v431_v35  ;;  %v2499_v39 = vpop.f32.mrb[16].mxu0  ;;  %2598 = vmatmul.mubr.msk.f32.gmra.mrb[40].mxu1 %vm758_vm1, %v2848_v37  ;;  %v2547_v50 = vpop.f32.mrb[16].mxu1 }
 0x100   :  { %2859 = vtanh.f32 %v436_v30  ;;  %v446_v43 = vadd.f32 %v2499_v39, %v3420_v18  ;;  %v440_v45 = vpop.f32.mrb[17].mxu0  ;;  %v3518_v52 = vadd.f32 %v2547_v50, %v3420_v18  ;;  %v600_v53 = vpop.f32.mrb[17].mxu1 }
 0x101   :  { %v2850_v47 = vpop.eup %2849  ;;  %v441_v48 = vadd.f32 %v3420_v18, %v440_v45  ;;  %v3522_v56 = vadd.f32 %v3420_v18, %v600_v53 }
 0x102   :  { %v2852_v49 = vpop.eup %2851  ;;  %2600 = vmatprep.mubr.msk.f32.mxu1 %vm758_vm1, %v2850_v47 }
 0x103   :  { %2861 = vtanh.f32 %v441_v48  ;;  %v2502_v51 = vpop.f32.mrb[18].mxu0  ;;  %2601 = vmatmul.mubr.msk.f32.gmra.mrb[42].mxu1 %vm758_vm1, %v2852_v49  ;;  %v2550_v61 = vpop.f32.mrb[18].mxu1 }
 0x104   :  { %2863 = vtanh.f32 %v446_v43  ;;  %v456_v54 = vadd.f32 %v2502_v51, %v3420_v18  ;;  %v450_v55 = vpop.f32.mrb[19].mxu0  ;;  %v3528_v0 = vadd.f32 %v2550_v61, %v3420_v18  ;;  %v610_v1 = vpop.f32.mrb[19].mxu1 }
 0x105   :  { %v2854_v57 = vpop.eup %2853  ;;  %v451_v59 = vadd.f32 %v3420_v18, %v450_v55  ;;  %v3532_v4 = vadd.f32 %v3420_v18, %v610_v1 }
 0x106   :  { %v2856_v60 = vpop.eup %2855  ;;  %2603 = vmatprep.mubr.msk.f32.mxu1 %vm758_vm1, %v2854_v57 }
 0x107   :  { %2865 = vtanh.f32 %v451_v59  ;;  %v2505_v63 = vpop.f32.mrb[20].mxu0  ;;  %2604 = vmatmul.mubr.msk.f32.gmra.mrb[44].mxu1 %vm758_vm1, %v2856_v60  ;;  %v2553_v10 = vpop.f32.mrb[20].mxu1 }
 0x108   :  { %2867 = vtanh.f32 %v456_v54  ;;  %v466_v2 = vadd.f32 %v2505_v63, %v3420_v18  ;;  %v460_v3 = vpop.f32.mrb[21].mxu0  ;;  %v3538_v12 = vadd.f32 %v2553_v10, %v3420_v18  ;;  %v620_v13 = vpop.f32.mrb[21].mxu1 }
 0x109   :  { %v2858_v6 = vpop.eup %2857  ;;  %v461_v7 = vadd.f32 %v3420_v18, %v460_v3  ;;  %v3542_v17 = vadd.f32 %v3420_v18, %v620_v13 }
 0x10a   :  { %v2860_v8 = vpop.eup %2859  ;;  %2606 = vmatprep.mubr.msk.f32.mxu1 %vm758_vm1, %v2858_v6  ;;  %v521_v6 = vadd.f32 %v3420_v18, %v3427_v26 }
 0x10b   :  { %2869 = vtanh.f32 %v461_v7  ;;  %v2508_v11 = vpop.f32.mrb[22].mxu0  ;;  %2607 = vmatmul.mubr.msk.f32.gmra.mrb[46].mxu1 %vm758_vm1, %v2860_v8  ;;  %v2556_v23 = vpop.f32.mrb[22].mxu1 }
 0x10c   :  { %2871 = vtanh.f32 %v466_v2  ;;  %v476_v14 = vadd.f32 %v2508_v11, %v3420_v18  ;;  %v470_v16 = vpop.f32.mrb[23].mxu0  ;;  %v3548_v27 = vadd.f32 %v2556_v23, %v3420_v18  ;;  %v630_v29 = vpop.f32.mrb[23].mxu1 }
 0x10d   :  { %v2862_v19 = vpop.eup %2861  ;;  %v471_v21 = vadd.f32 %v3420_v18, %v470_v16  ;;  %v3552_v34 = vadd.f32 %v3420_v18, %v630_v29 }
 0x10e   :  { %v2864_v22 = vpop.eup %2863  ;;  %2609 = vmatprep.mubr.msk.f32.mxu1 %vm758_vm1, %v2862_v19 }
 0x10f   :  { %2873 = vtanh.f32 %v471_v21  ;;  %v2511_v24 = vpop.f32.mrb[24].mxu0  ;;  %2610 = vmatmul.mubr.msk.f32.gmra.mrb[48].mxu1 %vm758_vm1, %v2864_v22  ;;  %v2559_v39 = vpop.f32.mrb[24].mxu1 }
 0x110   :  { %2875 = vtanh.f32 %v476_v14  ;;  %v486_v30 = vadd.f32 %v2511_v24, %v3420_v18  ;;  %v480_v31 = vpop.f32.mrb[25].mxu0  ;;  %v3558_v43 = vadd.f32 %v2559_v39, %v3420_v18  ;;  %v640_v45 = vpop.f32.mrb[25].mxu1 }
 0x111   :  { %v2866_v35 = vpop.eup %2865  ;;  %v481_v37 = vadd.f32 %v3420_v18, %v480_v31  ;;  %v3562_v49 = vadd.f32 %v3420_v18, %v640_v45 }
 0x112   :  { %v2868_v38 = vpop.eup %2867  ;;  %2612 = vmatprep.mubr.msk.f32.mxu1 %vm758_vm1, %v2866_v35 }
 0x113   :  { %2877 = vtanh.f32 %v481_v37  ;;  %v2514_v42 = vpop.f32.mrb[26].mxu0  ;;  %2613 = vmatmul.mubr.msk.f32.gmra.mrb[50].mxu1 %vm758_vm1, %v2868_v38  ;;  %v2562_v54 = vpop.f32.mrb[26].mxu1 }
 0x114   :  { %2879 = vtanh.f32 %v486_v30  ;;  %v496_v47 = vadd.f32 %v2514_v42, %v3420_v18  ;;  %v490_v48 = vpop.f32.mrb[27].mxu0  ;;  %v3568_v57 = vadd.f32 %v2562_v54, %v3420_v18  ;;  %v650_v59 = vpop.f32.mrb[27].mxu1 }
 0x115   :  { %v2870_v50 = vpop.eup %2869  ;;  %v491_v51 = vadd.f32 %v3420_v18, %v490_v48  ;;  %v3572_v63 = vadd.f32 %v3420_v18, %v650_v59 }
 0x116   :  { %v2872_v53 = vpop.eup %2871  ;;  %2615 = vmatprep.mubr.msk.f32.mxu1 %vm758_vm1, %v2870_v50 }
 0x117   :  { %2881 = vtanh.f32 %v491_v51  ;;  %v2517_v55 = vpop.f32.mrb[28].mxu0  ;;  %2616 = vmatmul.mubr.msk.f32.gmra.mrb[52].mxu1 %vm758_vm1, %v2872_v53  ;;  %v2565_v7 = vpop.f32.mrb[28].mxu1  ;;  %v3667_v53 = vld [vmem:[%s4127_s4] ss:$0 sm:$0xff] }
 0x118   :  { %2883 = vtanh.f32 %v496_v47  ;;  %v506_v60 = vadd.f32 %v2517_v55, %v3420_v18  ;;  %v500_v61 = vpop.f32.mrb[29].mxu0  ;;  %v3580_v10 = vadd.f32 %v2565_v7, %v3420_v18  ;;  %v660_v11 = vpop.f32.mrb[29].mxu1 }
 0x119   :  { %v2874_v1 = vpop.eup %2873  ;;  %v501_v2 = vadd.f32 %v3420_v18, %v500_v61  ;;  %v3584_v16 = vadd.f32 %v3420_v18, %v660_v11 }
 0x11a   :  { %v2876_v3 = vpop.eup %2875  ;;  %2618 = vmatprep.mubr.msk.f32.mxu1 %vm758_vm1, %v2874_v1 }
 0x11b   :  { %2885 = vtanh.f32 %v501_v2  ;;  %v2520_v8 = vpop.f32.mrb[30].mxu0  ;;  %2619 = vmatmul.mubr.msk.f32.gmra.mrb[54].mxu1 %vm758_vm1, %v2876_v3  ;;  %v2568_v22 = vpop.f32.mrb[30].mxu1 }
 0x11c   :  { %2887 = vtanh.f32 %v506_v60  ;;  %v516_v13 = vadd.f32 %v2520_v8, %v3420_v18  ;;  %v510_v14 = vpop.f32.mrb[31].mxu0  ;;  %v3590_v23 = vadd.f32 %v2568_v22, %v3420_v18  ;;  %v670_v24 = vpop.f32.mrb[31].mxu1 }
 0x11d   :  { %v2878_v19 = vpop.eup %2877  ;;  %v511_v21 = vadd.f32 %v3420_v18, %v510_v14  ;;  %2889 = vtanh.f32 %v521_v6  ;;  %v3593_v29 = vadd.f32 %v3420_v18, %v670_v24 }
 0x11e   :  { %v2880_v26 = vpop.eup %2879  ;;  %2621 = vmatprep.mubr.msk.f32.mxu1 %vm758_vm1, %v2878_v19 }
 0x11f   :  { %2891 = vtanh.f32 %v511_v21  ;;  %2622 = vmatmul.mubr.msk.f32.gmra.mrb[56].mxu1 %vm758_vm1, %v2880_v26 }
 0x120   :  { %2893 = vtanh.f32 %v516_v13 }
 0x121   :  { %v2882_v30 = vpop.eup %2881  ;;  %2895 = vtanh.f32 %v3436_v36 }
 0x122   :  { %v2884_v31 = vpop.eup %2883  ;;  %2624 = vmatprep.mubr.msk.f32.mxu1 %vm758_vm1, %v2882_v30  ;;  %2897 = vtanh.f32 %v3425_v25 }
 0x123   :  { %2625 = vmatmul.mubr.msk.f32.gmra.mrb[58].mxu1 %vm758_vm1, %v2884_v31  ;;  %2899 = vtanh.f32 %v3444_v44 }
 0x124   :  { %2901 = vtanh.f32 %v3432_v32 }
 0x125   :  { %v2886_v35 = vpop.eup %2885  ;;  %2903 = vtanh.f32 %v3472_v62 }
 0x126   :  { %v2888_v37 = vpop.eup %2887  ;;  %2627 = vmatprep.mubr.msk.f32.mxu1 %vm758_vm1, %v2886_v35  ;;  %2905 = vtanh.f32 %v3440_v40 }
 0x127   :  { %2628 = vmatmul.mubr.msk.f32.gmra.mrb[60].mxu1 %vm758_vm1, %v2888_v37  ;;  %v2890_v18 = vpop.eup %2889  ;;  %2907 = vtanh.f32 %v3482_v9 }
 0x128   :  { %2909 = vtanh.f32 %v3468_v58 }
 0x129   :  { %v2892_v38 = vpop.eup %2891  ;;  %2911 = vtanh.f32 %v3492_v20 }
 0x12a   :  { %v2894_v39 = vpop.eup %2893  ;;  %2630 = vmatprep.mubr.msk.f32.mxu1 %vm758_vm1, %v2892_v38  ;;  %2913 = vtanh.f32 %v3478_v5 }
 0x12b   :  { %2631 = vmatmul.mubr.msk.f32.gmra.mrb[62].mxu1 %vm758_vm1, %v2894_v39  ;;  %v2896_v25 = vpop.eup %2895  ;;  %2915 = vtanh.f32 %v3502_v33 }
 0x12c   :  { %2633 = vmatprep.mubr.msk.f32.mxu1 %vm758_vm1, %v2890_v18  ;;  %v2898_v36 = vpop.eup %2897  ;;  %2917 = vtanh.f32 %v3488_v15 }
 0x12d   :  { %v2900_v32 = vpop.eup %2899  ;;  %2919 = vtanh.f32 %v3512_v46 }
 0x12e   :  { %v2902_v44 = vpop.eup %2901  ;;  %2921 = vtanh.f32 %v3498_v28 }
 0x12f   :  { %2634 = vmatmul.mubr.msk.f32.gmra.mrb[64].mxu1 %vm758_vm1, %v2898_v36  ;;  %v2904_v40 = vpop.eup %2903  ;;  %2923 = vtanh.f32 %v3522_v56 }
 0x130   :  { %2636 = vmatprep.mubr.msk.f32.mxu1 %vm758_vm1, %v2896_v25  ;;  %v2906_v62 = vpop.eup %2905  ;;  %2925 = vtanh.f32 %v3508_v41 }
 0x131   :  { %v2908_v58 = vpop.eup %2907  ;;  %2927 = vtanh.f32 %v3532_v4 }
 0x132   :  { %v2910_v9 = vpop.eup %2909  ;;  %2929 = vtanh.f32 %v3518_v52 }
 0x133   :  { %2637 = vmatmul.mubr.msk.f32.gmra.mrb[66].mxu1 %vm758_vm1, %v2902_v44  ;;  %v2912_v5 = vpop.eup %2911  ;;  %2931 = vtanh.f32 %v3542_v17 }
 0x134   :  { %2639 = vmatprep.mubr.msk.f32.mxu1 %vm758_vm1, %v2900_v32  ;;  %v2914_v20 = vpop.eup %2913  ;;  %2933 = vtanh.f32 %v3528_v0 }
 0x135   :  { %v2916_v15 = vpop.eup %2915  ;;  %2935 = vtanh.f32 %v3552_v34 }
 0x136   :  { %v2918_v33 = vpop.eup %2917  ;;  %2937 = vtanh.f32 %v3538_v12 }
 0x137   :  { %2640 = vmatmul.mubr.msk.f32.gmra.mrb[68].mxu1 %vm758_vm1, %v2906_v62  ;;  %v2920_v28 = vpop.eup %2919  ;;  %2939 = vtanh.f32 %v3562_v49 }
 0x138   :  { %2642 = vmatprep.mubr.msk.f32.mxu1 %vm758_vm1, %v2904_v40  ;;  %v2922_v46 = vpop.eup %2921  ;;  %2941 = vtanh.f32 %v3548_v27 }
 0x139   :  { %v2924_v41 = vpop.eup %2923  ;;  %2943 = vtanh.f32 %v3572_v63 }
 0x13a   :  { %v2926_v56 = vpop.eup %2925  ;;  %2945 = vtanh.f32 %v3558_v43 }
 0x13b   :  { %2643 = vmatmul.mubr.msk.f32.gmra.mrb[70].mxu1 %vm758_vm1, %v2910_v9  ;;  %v2928_v52 = vpop.eup %2927  ;;  %2947 = vtanh.f32 %v3584_v16 }
 0x13c   :  { %2645 = vmatprep.mubr.msk.f32.mxu1 %vm758_vm1, %v2908_v58  ;;  %v2930_v4 = vpop.eup %2929  ;;  %2949 = vtanh.f32 %v3568_v57 }
 0x13d   :  { %v2932_v0 = vpop.eup %2931  ;;  %2951 = vtanh.f32 %v3593_v29 }
 0x13e   :  { %v2934_v17 = vpop.eup %2933  ;;  %2953 = vtanh.f32 %v3580_v10 }
 0x13f   :  { %2646 = vmatmul.mubr.msk.f32.gmra.mrb[72].mxu1 %vm758_vm1, %v2914_v20  ;;  %v2936_v12 = vpop.eup %2935  ;;  %2955 = vtanh.f32 %v3590_v23 }
 0x140   :  { %2648 = vmatprep.mubr.msk.f32.mxu1 %vm758_vm1, %v2912_v5  ;;  %v2938_v34 = vpop.eup %2937 }
 0x141   :  { %v2940_v27 = vpop.eup %2939 }
 0x142   :  { %v2942_v42 = vpop.eup %2941 }
 0x143   :  { %2649 = vmatmul.mubr.msk.f32.gmra.mrb[74].mxu1 %vm758_vm1, %v2918_v33  ;;  %v2944_v43 = vpop.eup %2943 }
 0x144   :  { %2651 = vmatprep.mubr.msk.f32.mxu1 %vm758_vm1, %v2916_v15  ;;  %v2946_v45 = vpop.eup %2945 }
 0x145   :  { %v2948_v47 = vpop.eup %2947 }
 0x146   :  { %v2950_v48 = vpop.eup %2949 }
 0x147   :  { %2652 = vmatmul.mubr.msk.f32.gmra.mrb[76].mxu1 %vm758_vm1, %v2922_v46  ;;  %v2952_v49 = vpop.eup %2951 }
 0x148   :  { %2654 = vmatprep.mubr.msk.f32.mxu1 %vm758_vm1, %v2920_v28  ;;  %v2954_v50 = vpop.eup %2953 }
 0x149   :  { %v2956_v51 = vpop.eup %2955 }
 0x14b   :  { %2655 = vmatmul.mubr.msk.f32.gmra.mrb[78].mxu1 %vm758_vm1, %v2926_v56 }
 0x14c   :  { %2657 = vmatprep.mubr.msk.f32.mxu1 %vm758_vm1, %v2924_v41 }
 0x14f   :  { %2658 = vmatmul.mubr.msk.f32.gmra.mrb[80].mxu1 %vm758_vm1, %v2930_v4 }
 0x150   :  { %2660 = vmatprep.mubr.msk.f32.mxu1 %vm758_vm1, %v2928_v52 }
 0x153   :  { %2661 = vmatmul.mubr.msk.f32.gmra.mrb[82].mxu1 %vm758_vm1, %v2934_v17 }
 0x154   :  { %2663 = vmatprep.mubr.msk.f32.mxu1 %vm758_vm1, %v2932_v0 }
 0x157   :  { %2664 = vmatmul.mubr.msk.f32.gmra.mrb[84].mxu1 %vm758_vm1, %v2938_v34 }
 0x158   :  { %2666 = vmatprep.mubr.msk.f32.mxu1 %vm758_vm1, %v2936_v12 }
 0x15b   :  { %2667 = vmatmul.mubr.msk.f32.gmra.mrb[86].mxu1 %vm758_vm1, %v2942_v42 }
 0x15c   :  { %2669 = vmatprep.mubr.msk.f32.mxu1 %vm758_vm1, %v2940_v27 }
 0x15f   :  { %2670 = vmatmul.mubr.msk.f32.gmra.mrb[88].mxu1 %vm758_vm1, %v2946_v45 }
 0x160   :  { %2672 = vmatprep.mubr.msk.f32.mxu1 %vm758_vm1, %v2944_v43 }
 0x163   :  { %2673 = vmatmul.mubr.msk.f32.gmra.mrb[90].mxu1 %vm758_vm1, %v2950_v48 }
 0x164   :  { %2675 = vmatprep.mubr.msk.f32.mxu1 %vm758_vm1, %v2948_v47 }
 0x167   :  { %2676 = vmatmul.mubr.msk.f32.gmra.mrb[92].mxu1 %vm758_vm1, %v2954_v50 }
 0x168   :  { %2678 = vmatprep.mubr.msk.f32.mxu1 %vm758_vm1, %v2952_v49 }
 0x16b   :  { %2679 = vmatmul.mubr.msk.f32.gmra.mrb[94].mxu1 %vm758_vm1, %v2956_v51 }
 0x1c2   :  { %v2587_v54 = vpop.f32.mrb[32].mxu1 }
 0x1c3   :  { %v1023_v55 = vadd.f32 %v2587_v54, %v3667_v53  ;;  %v1017_v57 = vpop.f32.mrb[33].mxu1 }
 0x1c4   :  { %v1018_v59 = vadd.f32 %v3667_v53, %v1017_v57 }
 0x1c6   :  { %2957 = vtanh.f32 %v1018_v59  ;;  %v2590_v60 = vpop.f32.mrb[34].mxu1 }
 0x1c7   :  { %2959 = vtanh.f32 %v1023_v55  ;;  %v1033_v61 = vadd.f32 %v2590_v60, %v3667_v53  ;;  %v1027_v63 = vpop.f32.mrb[35].mxu1 }
 0x1c8   :  { %v1028_v1 = vadd.f32 %v3667_v53, %v1027_v63 }
 0x1ca   :  { %2961 = vtanh.f32 %v1028_v1  ;;  %v2593_v2 = vpop.f32.mrb[36].mxu1 }
 0x1cb   :  { %2963 = vtanh.f32 %v1033_v61  ;;  %v1043_v3 = vadd.f32 %v2593_v2, %v3667_v53  ;;  %v1037_v6 = vpop.f32.mrb[37].mxu1 }
 0x1cc   :  { %v1038_v7 = vadd.f32 %v3667_v53, %v1037_v6 }
 0x1ce   :  { %2965 = vtanh.f32 %v1038_v7  ;;  %v2596_v8 = vpop.f32.mrb[38].mxu1 }
 0x1cf   :  { %2967 = vtanh.f32 %v1043_v3  ;;  %v1053_v10 = vadd.f32 %v2596_v8, %v3667_v53  ;;  %v1047_v11 = vpop.f32.mrb[39].mxu1 }
 0x1d0   :  { %v2958_v13 = vpop.eup %2957  ;;  %v1048_v14 = vadd.f32 %v3667_v53, %v1047_v11 }
 0x1d1   :  { %v2960_v16 = vpop.eup %2959  ;;  %2693 = vmatprep.mubr.msk.f32.mxu0 %vm1413_vm2, %v2958_v13 }
 0x1d2   :  { %2969 = vtanh.f32 %v1048_v14  ;;  %v2599_v19 = vpop.f32.mrb[40].mxu1  ;;  %2694 = vmatmul.mubr.msk.f32.vlgmr.msra.gmra.mrb[32].mxu0 %vm1413_vm2, %v2960_v16 }
 0x1d3   :  { %2971 = vtanh.f32 %v1053_v10  ;;  %v1063_v21 = vadd.f32 %v2599_v19, %v3667_v53  ;;  %v1057_v26 = vpop.f32.mrb[41].mxu1 }
 0x1d4   :  { %v2962_v22 = vpop.eup %2961  ;;  %v1058_v23 = vadd.f32 %v3667_v53, %v1057_v26 }
 0x1d5   :  { %v2964_v24 = vpop.eup %2963  ;;  %2696 = vmatprep.mubr.msk.f32.mxu0 %vm1413_vm2, %v2962_v22 }
 0x1d6   :  { %2973 = vtanh.f32 %v1058_v23  ;;  %v2602_v29 = vpop.f32.mrb[42].mxu1  ;;  %2697 = vmatmul.mubr.msk.f32.gmra.mrb[34].mxu0 %vm1413_vm2, %v2964_v24 }
 0x1d7   :  { %2975 = vtanh.f32 %v1063_v21  ;;  %v1073_v30 = vadd.f32 %v2602_v29, %v3667_v53  ;;  %v1067_v31 = vpop.f32.mrb[43].mxu1 }
 0x1d8   :  { %v2966_v35 = vpop.eup %2965  ;;  %v1068_v37 = vadd.f32 %v3667_v53, %v1067_v31 }
 0x1d9   :  { %v2968_v18 = vpop.eup %2967  ;;  %2699 = vmatprep.mubr.msk.f32.mxu0 %vm1413_vm2, %v2966_v35 }
 0x1da   :  { %2977 = vtanh.f32 %v1068_v37  ;;  %v2605_v38 = vpop.f32.mrb[44].mxu1  ;;  %2700 = vmatmul.mubr.msk.f32.gmra.mrb[36].mxu0 %vm1413_vm2, %v2968_v18 }
 0x1db   :  { %2979 = vtanh.f32 %v1073_v30  ;;  %v1083_v39 = vadd.f32 %v2605_v38, %v3667_v53  ;;  %v1077_v25 = vpop.f32.mrb[45].mxu1 }
 0x1dc   :  { %v2970_v36 = vpop.eup %2969  ;;  %v1078_v32 = vadd.f32 %v3667_v53, %v1077_v25 }
 0x1dd   :  { %v2972_v44 = vpop.eup %2971  ;;  %2702 = vmatprep.mubr.msk.f32.mxu0 %vm1413_vm2, %v2970_v36 }
 0x1de   :  { %2981 = vtanh.f32 %v1078_v32  ;;  %v2608_v40 = vpop.f32.mrb[46].mxu1  ;;  %2703 = vmatmul.mubr.msk.f32.gmra.mrb[38].mxu0 %vm1413_vm2, %v2972_v44 }
 0x1df   :  { %2983 = vtanh.f32 %v1083_v39  ;;  %v1093_v62 = vadd.f32 %v2608_v40, %v3667_v53  ;;  %v1087_v58 = vpop.f32.mrb[47].mxu1 }
 0x1e0   :  { %v2974_v9 = vpop.eup %2973  ;;  %v1088_v5 = vadd.f32 %v3667_v53, %v1087_v58 }
 0x1e1   :  { %v2976_v20 = vpop.eup %2975  ;;  %2705 = vmatprep.mubr.msk.f32.mxu0 %vm1413_vm2, %v2974_v9 }
 0x1e2   :  { %2985 = vtanh.f32 %v1088_v5  ;;  %v2611_v15 = vpop.f32.mrb[48].mxu1  ;;  %2706 = vmatmul.mubr.msk.f32.gmra.mrb[40].mxu0 %vm1413_vm2, %v2976_v20 }
 0x1e3   :  { %2987 = vtanh.f32 %v1093_v62  ;;  %v1103_v33 = vadd.f32 %v2611_v15, %v3667_v53  ;;  %v1097_v28 = vpop.f32.mrb[49].mxu1 }
 0x1e4   :  { %v2978_v46 = vpop.eup %2977  ;;  %v1098_v41 = vadd.f32 %v3667_v53, %v1097_v28 }
 0x1e5   :  { %v2980_v56 = vpop.eup %2979  ;;  %2708 = vmatprep.mubr.msk.f32.mxu0 %vm1413_vm2, %v2978_v46 }
 0x1e6   :  { %2989 = vtanh.f32 %v1098_v41  ;;  %v2614_v52 = vpop.f32.mrb[50].mxu1  ;;  %2709 = vmatmul.mubr.msk.f32.gmra.mrb[42].mxu0 %vm1413_vm2, %v2980_v56 }
 0x1e7   :  { %2991 = vtanh.f32 %v1103_v33  ;;  %v1113_v4 = vadd.f32 %v2614_v52, %v3667_v53  ;;  %v1107_v0 = vpop.f32.mrb[51].mxu1 }
 0x1e8   :  { %v2982_v17 = vpop.eup %2981  ;;  %v1108_v12 = vadd.f32 %v3667_v53, %v1107_v0 }
 0x1e9   :  { %v2984_v34 = vpop.eup %2983  ;;  %2711 = vmatprep.mubr.msk.f32.mxu0 %vm1413_vm2, %v2982_v17 }
 0x1ea   :  { %2993 = vtanh.f32 %v1108_v12  ;;  %v2617_v27 = vpop.f32.mrb[52].mxu1  ;;  %2712 = vmatmul.mubr.msk.f32.gmra.mrb[44].mxu0 %vm1413_vm2, %v2984_v34 }
 0x1eb   :  { %2995 = vtanh.f32 %v1113_v4  ;;  %v1123_v42 = vadd.f32 %v2617_v27, %v3667_v53  ;;  %v1117_v43 = vpop.f32.mrb[53].mxu1 }
 0x1ec   :  { %v2986_v45 = vpop.eup %2985  ;;  %v1118_v47 = vadd.f32 %v3667_v53, %v1117_v43 }
 0x1ed   :  { %v2988_v48 = vpop.eup %2987  ;;  %2714 = vmatprep.mubr.msk.f32.mxu0 %vm1413_vm2, %v2986_v45 }
 0x1ee   :  { %2997 = vtanh.f32 %v1118_v47  ;;  %v2620_v49 = vpop.f32.mrb[54].mxu1  ;;  %2715 = vmatmul.mubr.msk.f32.gmra.mrb[46].mxu0 %vm1413_vm2, %v2988_v48 }
 0x1ef   :  { %2999 = vtanh.f32 %v1123_v42  ;;  %v1133_v50 = vadd.f32 %v2620_v49, %v3667_v53  ;;  %v1127_v51 = vpop.f32.mrb[55].mxu1 }
 0x1f0   :  { %v2990_v54 = vpop.eup %2989  ;;  %v1128_v55 = vadd.f32 %v3667_v53, %v1127_v51 }
 0x1f1   :  { %v2992_v57 = vpop.eup %2991  ;;  %2717 = vmatprep.mubr.msk.f32.mxu0 %vm1413_vm2, %v2990_v54 }
 0x1f2   :  { %3001 = vtanh.f32 %v1128_v55  ;;  %v2623_v59 = vpop.f32.mrb[56].mxu1  ;;  %2718 = vmatmul.mubr.msk.f32.gmra.mrb[48].mxu0 %vm1413_vm2, %v2992_v57 }
 0x1f3   :  { %3003 = vtanh.f32 %v1133_v50  ;;  %v1143_v60 = vadd.f32 %v2623_v59, %v3667_v53  ;;  %v1137_v61 = vpop.f32.mrb[57].mxu1 }
 0x1f4   :  { %v2994_v63 = vpop.eup %2993  ;;  %v1138_v1 = vadd.f32 %v3667_v53, %v1137_v61 }
 0x1f5   :  { %v2996_v2 = vpop.eup %2995  ;;  %2720 = vmatprep.mubr.msk.f32.mxu0 %vm1413_vm2, %v2994_v63 }
 0x1f6   :  { %3005 = vtanh.f32 %v1138_v1  ;;  %v2626_v3 = vpop.f32.mrb[58].mxu1  ;;  %2721 = vmatmul.mubr.msk.f32.gmra.mrb[50].mxu0 %vm1413_vm2, %v2996_v2 }
 0x1f7   :  { %3007 = vtanh.f32 %v1143_v60  ;;  %v1153_v6 = vadd.f32 %v2626_v3, %v3667_v53  ;;  %v1147_v7 = vpop.f32.mrb[59].mxu1 }
 0x1f8   :  { %v2998_v8 = vpop.eup %2997  ;;  %v1148_v10 = vadd.f32 %v3667_v53, %v1147_v7 }
 0x1f9   :  { %v3000_v11 = vpop.eup %2999  ;;  %2723 = vmatprep.mubr.msk.f32.mxu0 %vm1413_vm2, %v2998_v8 }
 0x1fa   :  { %3009 = vtanh.f32 %v1148_v10  ;;  %v2629_v13 = vpop.f32.mrb[60].mxu1  ;;  %2724 = vmatmul.mubr.msk.f32.gmra.mrb[52].mxu0 %vm1413_vm2, %v3000_v11 }
 0x1fb   :  { %3011 = vtanh.f32 %v1153_v6  ;;  %v1163_v14 = vadd.f32 %v2629_v13, %v3667_v53  ;;  %v1157_v16 = vpop.f32.mrb[61].mxu1 }
 0x1fc   :  { %v3002_v19 = vpop.eup %3001  ;;  %v1158_v21 = vadd.f32 %v3667_v53, %v1157_v16 }
 0x1fd   :  { %v3004_v26 = vpop.eup %3003  ;;  %2726 = vmatprep.mubr.msk.f32.mxu0 %vm1413_vm2, %v3002_v19 }
 0x1fe   :  { %3013 = vtanh.f32 %v1158_v21  ;;  %v2632_v22 = vpop.f32.mrb[62].mxu1  ;;  %2727 = vmatmul.mubr.msk.f32.gmra.mrb[54].mxu0 %vm1413_vm2, %v3004_v26 }
 0x1ff   :  { %3015 = vtanh.f32 %v1163_v14  ;;  %v1173_v23 = vadd.f32 %v2632_v22, %v3667_v53  ;;  %v1167_v24 = vpop.f32.mrb[63].mxu1 }
 0x200   :  { %v3006_v29 = vpop.eup %3005  ;;  %v1168_v30 = vadd.f32 %v3667_v53, %v1167_v24 }
 0x201   :  { %v3008_v31 = vpop.eup %3007  ;;  %2729 = vmatprep.mubr.msk.f32.mxu0 %vm1413_vm2, %v3006_v29 }
 0x202   :  { %3017 = vtanh.f32 %v1168_v30  ;;  %v2635_v35 = vpop.f32.mrb[64].mxu1  ;;  %2730 = vmatmul.mubr.msk.f32.gmra.mrb[56].mxu0 %vm1413_vm2, %v3008_v31 }
 0x203   :  { %3019 = vtanh.f32 %v1173_v23  ;;  %v1183_v37 = vadd.f32 %v2635_v35, %v3667_v53  ;;  %v1177_v18 = vpop.f32.mrb[65].mxu1 }
 0x204   :  { %v3010_v38 = vpop.eup %3009  ;;  %v1178_v39 = vadd.f32 %v3667_v53, %v1177_v18 }
 0x205   :  { %v3012_v25 = vpop.eup %3011  ;;  %2732 = vmatprep.mubr.msk.f32.mxu0 %vm1413_vm2, %v3010_v38 }
 0x206   :  { %3021 = vtanh.f32 %v1178_v39  ;;  %v2638_v36 = vpop.f32.mrb[66].mxu1  ;;  %2733 = vmatmul.mubr.msk.f32.gmra.mrb[58].mxu0 %vm1413_vm2, %v3012_v25 }
 0x207   :  { %3023 = vtanh.f32 %v1183_v37  ;;  %v1193_v32 = vadd.f32 %v2638_v36, %v3667_v53  ;;  %v1187_v44 = vpop.f32.mrb[67].mxu1 }
 0x208   :  { %v3014_v40 = vpop.eup %3013  ;;  %v1188_v62 = vadd.f32 %v3667_v53, %v1187_v44 }
 0x209   :  { %v3016_v58 = vpop.eup %3015  ;;  %2735 = vmatprep.mubr.msk.f32.mxu0 %vm1413_vm2, %v3014_v40 }
 0x20a   :  { %3025 = vtanh.f32 %v1188_v62  ;;  %v2641_v9 = vpop.f32.mrb[68].mxu1  ;;  %2736 = vmatmul.mubr.msk.f32.gmra.mrb[60].mxu0 %vm1413_vm2, %v3016_v58 }
 0x20b   :  { %3027 = vtanh.f32 %v1193_v32  ;;  %v1203_v5 = vadd.f32 %v2641_v9, %v3667_v53  ;;  %v1197_v20 = vpop.f32.mrb[69].mxu1 }
 0x20c   :  { %v3018_v15 = vpop.eup %3017  ;;  %v1198_v33 = vadd.f32 %v3667_v53, %v1197_v20 }
 0x20d   :  { %v3020_v28 = vpop.eup %3019  ;;  %2738 = vmatprep.mubr.msk.f32.mxu0 %vm1413_vm2, %v3018_v15 }
 0x20e   :  { %3029 = vtanh.f32 %v1198_v33  ;;  %v2644_v46 = vpop.f32.mrb[70].mxu1  ;;  %2739 = vmatmul.mubr.msk.f32.gmra.mrb[62].mxu0 %vm1413_vm2, %v3020_v28 }
 0x20f   :  { %3031 = vtanh.f32 %v1203_v5  ;;  %v1213_v41 = vadd.f32 %v2644_v46, %v3667_v53  ;;  %v1207_v56 = vpop.f32.mrb[71].mxu1 }
 0x210   :  { %v3022_v52 = vpop.eup %3021  ;;  %v1208_v4 = vadd.f32 %v3667_v53, %v1207_v56 }
 0x211   :  { %v3024_v0 = vpop.eup %3023  ;;  %2741 = vmatprep.mubr.msk.f32.mxu0 %vm1413_vm2, %v3022_v52 }
 0x212   :  { %3033 = vtanh.f32 %v1208_v4  ;;  %v2647_v17 = vpop.f32.mrb[72].mxu1  ;;  %2742 = vmatmul.mubr.msk.f32.gmra.mrb[64].mxu0 %vm1413_vm2, %v3024_v0 }
 0x213   :  { %3035 = vtanh.f32 %v1213_v41  ;;  %v1223_v12 = vadd.f32 %v2647_v17, %v3667_v53  ;;  %v1217_v34 = vpop.f32.mrb[73].mxu1 }
 0x214   :  { %v3026_v27 = vpop.eup %3025  ;;  %v1218_v42 = vadd.f32 %v3667_v53, %v1217_v34 }
 0x215   :  { %v3028_v43 = vpop.eup %3027  ;;  %2744 = vmatprep.mubr.msk.f32.mxu0 %vm1413_vm2, %v3026_v27 }
 0x216   :  { %3037 = vtanh.f32 %v1218_v42  ;;  %v2650_v45 = vpop.f32.mrb[74].mxu1  ;;  %2745 = vmatmul.mubr.msk.f32.gmra.mrb[66].mxu0 %vm1413_vm2, %v3028_v43 }
 0x217   :  { %3039 = vtanh.f32 %v1223_v12  ;;  %v1233_v47 = vadd.f32 %v2650_v45, %v3667_v53  ;;  %v1227_v48 = vpop.f32.mrb[75].mxu1 }
 0x218   :  { %v3030_v49 = vpop.eup %3029  ;;  %v1228_v50 = vadd.f32 %v3667_v53, %v1227_v48 }
 0x219   :  { %v3032_v51 = vpop.eup %3031  ;;  %2747 = vmatprep.mubr.msk.f32.mxu0 %vm1413_vm2, %v3030_v49 }
 0x21a   :  { %3041 = vtanh.f32 %v1228_v50  ;;  %v2653_v54 = vpop.f32.mrb[76].mxu1  ;;  %2748 = vmatmul.mubr.msk.f32.gmra.mrb[68].mxu0 %vm1413_vm2, %v3032_v51 }
 0x21b   :  { %3043 = vtanh.f32 %v1233_v47  ;;  %v1243_v55 = vadd.f32 %v2653_v54, %v3667_v53  ;;  %v1237_v57 = vpop.f32.mrb[77].mxu1 }
 0x21c   :  { %v3034_v59 = vpop.eup %3033  ;;  %v1238_v60 = vadd.f32 %v3667_v53, %v1237_v57  ;;  %v3800_v57 = vld [vmem:[%s4128_s6] ss:$0 sm:$0xff] }
 0x21d   :  { %v3036_v61 = vpop.eup %3035  ;;  %2750 = vmatprep.mubr.msk.f32.mxu0 %vm1413_vm2, %v3034_v59 }
 0x21e   :  { %3045 = vtanh.f32 %v1238_v60  ;;  %v2656_v63 = vpop.f32.mrb[78].mxu1  ;;  %2751 = vmatmul.mubr.msk.f32.gmra.mrb[70].mxu0 %vm1413_vm2, %v3036_v61 }
 0x21f   :  { %3047 = vtanh.f32 %v1243_v55  ;;  %v1253_v1 = vadd.f32 %v2656_v63, %v3667_v53  ;;  %v1247_v2 = vpop.f32.mrb[79].mxu1 }
 0x220   :  { %v3038_v3 = vpop.eup %3037  ;;  %v1248_v6 = vadd.f32 %v3667_v53, %v1247_v2 }
 0x221   :  { %v3040_v7 = vpop.eup %3039  ;;  %2753 = vmatprep.mubr.msk.f32.mxu0 %vm1413_vm2, %v3038_v3 }
 0x222   :  { %3049 = vtanh.f32 %v1248_v6  ;;  %v2659_v8 = vpop.f32.mrb[80].mxu1  ;;  %2754 = vmatmul.mubr.msk.f32.gmra.mrb[72].mxu0 %vm1413_vm2, %v3040_v7 }
 0x223   :  { %3051 = vtanh.f32 %v1253_v1  ;;  %v1263_v10 = vadd.f32 %v2659_v8, %v3667_v53  ;;  %v1257_v11 = vpop.f32.mrb[81].mxu1 }
 0x224   :  { %v3042_v13 = vpop.eup %3041  ;;  %v1258_v14 = vadd.f32 %v3667_v53, %v1257_v11 }
 0x225   :  { %v3044_v16 = vpop.eup %3043  ;;  %2756 = vmatprep.mubr.msk.f32.mxu0 %vm1413_vm2, %v3042_v13 }
 0x226   :  { %3053 = vtanh.f32 %v1258_v14  ;;  %v2662_v19 = vpop.f32.mrb[82].mxu1  ;;  %2757 = vmatmul.mubr.msk.f32.gmra.mrb[74].mxu0 %vm1413_vm2, %v3044_v16 }
 0x227   :  { %3055 = vtanh.f32 %v1263_v10  ;;  %v1273_v21 = vadd.f32 %v2662_v19, %v3667_v53  ;;  %v1267_v26 = vpop.f32.mrb[83].mxu1 }
 0x228   :  { %v3046_v22 = vpop.eup %3045  ;;  %v1268_v23 = vadd.f32 %v3667_v53, %v1267_v26 }
 0x229   :  { %v3048_v24 = vpop.eup %3047  ;;  %2759 = vmatprep.mubr.msk.f32.mxu0 %vm1413_vm2, %v3046_v22 }
 0x22a   :  { %3057 = vtanh.f32 %v1268_v23  ;;  %v2665_v29 = vpop.f32.mrb[84].mxu1  ;;  %2760 = vmatmul.mubr.msk.f32.gmra.mrb[76].mxu0 %vm1413_vm2, %v3048_v24 }
 0x22b   :  { %3059 = vtanh.f32 %v1273_v21  ;;  %v1283_v30 = vadd.f32 %v2665_v29, %v3667_v53  ;;  %v1277_v31 = vpop.f32.mrb[85].mxu1 }
 0x22c   :  { %v3050_v35 = vpop.eup %3049  ;;  %v1278_v37 = vadd.f32 %v3667_v53, %v1277_v31 }
 0x22d   :  { %v3052_v18 = vpop.eup %3051  ;;  %2762 = vmatprep.mubr.msk.f32.mxu0 %vm1413_vm2, %v3050_v35 }
 0x22e   :  { %3061 = vtanh.f32 %v1278_v37  ;;  %v2668_v38 = vpop.f32.mrb[86].mxu1  ;;  %2763 = vmatmul.mubr.msk.f32.gmra.mrb[78].mxu0 %vm1413_vm2, %v3052_v18 }
 0x22f   :  { %3063 = vtanh.f32 %v1283_v30  ;;  %v1293_v39 = vadd.f32 %v2668_v38, %v3667_v53  ;;  %v1287_v25 = vpop.f32.mrb[87].mxu1 }
 0x230   :  { %v3054_v36 = vpop.eup %3053  ;;  %v1288_v32 = vadd.f32 %v3667_v53, %v1287_v25 }
 0x231   :  { %v3056_v44 = vpop.eup %3055  ;;  %2765 = vmatprep.mubr.msk.f32.mxu0 %vm1413_vm2, %v3054_v36 }
 0x232   :  { %3065 = vtanh.f32 %v1288_v32  ;;  %v2671_v40 = vpop.f32.mrb[88].mxu1  ;;  %2766 = vmatmul.mubr.msk.f32.gmra.mrb[80].mxu0 %vm1413_vm2, %v3056_v44 }
 0x233   :  { %3067 = vtanh.f32 %v1293_v39  ;;  %v1303_v62 = vadd.f32 %v2671_v40, %v3667_v53  ;;  %v1297_v58 = vpop.f32.mrb[89].mxu1 }
 0x234   :  { %v3058_v9 = vpop.eup %3057  ;;  %v1298_v5 = vadd.f32 %v3667_v53, %v1297_v58 }
 0x235   :  { %v3060_v20 = vpop.eup %3059  ;;  %2768 = vmatprep.mubr.msk.f32.mxu0 %vm1413_vm2, %v3058_v9 }
 0x236   :  { %3069 = vtanh.f32 %v1298_v5  ;;  %v2674_v15 = vpop.f32.mrb[90].mxu1  ;;  %2769 = vmatmul.mubr.msk.f32.gmra.mrb[82].mxu0 %vm1413_vm2, %v3060_v20 }
 0x237   :  { %3071 = vtanh.f32 %v1303_v62  ;;  %v1313_v33 = vadd.f32 %v2674_v15, %v3667_v53  ;;  %v1307_v28 = vpop.f32.mrb[91].mxu1 }
 0x238   :  { %v3062_v46 = vpop.eup %3061  ;;  %v1308_v41 = vadd.f32 %v3667_v53, %v1307_v28 }
 0x239   :  { %v3064_v56 = vpop.eup %3063  ;;  %2771 = vmatprep.mubr.msk.f32.mxu0 %vm1413_vm2, %v3062_v46 }
 0x23a   :  { %3073 = vtanh.f32 %v1308_v41  ;;  %v2677_v52 = vpop.f32.mrb[92].mxu1  ;;  %2772 = vmatmul.mubr.msk.f32.gmra.mrb[84].mxu0 %vm1413_vm2, %v3064_v56 }
 0x23b   :  { %3075 = vtanh.f32 %v1313_v33  ;;  %v1323_v4 = vadd.f32 %v2677_v52, %v3667_v53  ;;  %v1317_v0 = vpop.f32.mrb[93].mxu1 }
 0x23c   :  { %v3066_v17 = vpop.eup %3065  ;;  %v1318_v12 = vadd.f32 %v3667_v53, %v1317_v0 }
 0x23d   :  { %v3068_v34 = vpop.eup %3067  ;;  %2774 = vmatprep.mubr.msk.f32.mxu0 %vm1413_vm2, %v3066_v17 }
 0x23e   :  { %3077 = vtanh.f32 %v1318_v12  ;;  %v2680_v27 = vpop.f32.mrb[94].mxu1  ;;  %2775 = vmatmul.mubr.msk.f32.gmra.mrb[86].mxu0 %vm1413_vm2, %v3068_v34 }
 0x23f   :  { %3079 = vtanh.f32 %v1323_v4  ;;  %v1333_v42 = vadd.f32 %v2680_v27, %v3667_v53  ;;  %v1327_v43 = vpop.f32.mrb[95].mxu1 }
 0x240   :  { %v3070_v45 = vpop.eup %3069  ;;  %v1328_v47 = vadd.f32 %v3667_v53, %v1327_v43 }
 0x241   :  { %v3072_v48 = vpop.eup %3071  ;;  %2777 = vmatprep.mubr.msk.f32.mxu0 %vm1413_vm2, %v3070_v45 }
 0x242   :  { %3081 = vtanh.f32 %v1328_v47  ;;  %2778 = vmatmul.mubr.msk.f32.gmra.mrb[88].mxu0 %vm1413_vm2, %v3072_v48 }
 0x243   :  { %3083 = vtanh.f32 %v1333_v42 }
 0x244   :  { %v3074_v49 = vpop.eup %3073 }
 0x245   :  { %v3076_v50 = vpop.eup %3075  ;;  %2780 = vmatprep.mubr.msk.f32.mxu0 %vm1413_vm2, %v3074_v49 }
 0x246   :  { %2781 = vmatmul.mubr.msk.f32.gmra.mrb[90].mxu0 %vm1413_vm2, %v3076_v50 }
 0x248   :  { %v3078_v51 = vpop.eup %3077 }
 0x249   :  { %v3080_v54 = vpop.eup %3079  ;;  %2783 = vmatprep.mubr.msk.f32.mxu0 %vm1413_vm2, %v3078_v51 }
 0x24a   :  { %2784 = vmatmul.mubr.msk.f32.gmra.mrb[92].mxu0 %vm1413_vm2, %v3080_v54 }
 0x24c   :  { %v3082_v53 = vpop.eup %3081 }
 0x24d   :  { %v3084_v55 = vpop.eup %3083  ;;  %2786 = vmatprep.mubr.msk.f32.mxu0 %vm1413_vm2, %v3082_v53 }
 0x24e   :  { %2787 = vmatmul.mubr.msk.f32.gmra.mrb[94].mxu0 %vm1413_vm2, %v3084_v55 }
 0x2a5   :  { %v2695_v59 = vpop.f32.mrb[32].mxu0 }
 0x2a6   :  { %v1678_v60 = vadd.f32 %v2695_v59, %v3800_v57  ;;  %v1672_v61 = vpop.f32.mrb[33].mxu0 }
 0x2a7   :  { %v1673_v63 = vadd.f32 %v3800_v57, %v1672_v61 }
 0x2a8   :  { %1993 = vst.msk [vmem:[%s4129_s7 + $0x8] sm:$0xff] %vm1991_vm3, %v1678_v60 }
 0x2a9   :  { %1992 = vst.msk [vmem:[%s4129_s7] sm:$0xff] %vm1991_vm3, %v1673_v63  ;;  %v2698_v1 = vpop.f32.mrb[34].mxu0 }
 0x2aa   :  { %v1688_v2 = vadd.f32 %v2698_v1, %v3800_v57  ;;  %v1682_v3 = vpop.f32.mrb[35].mxu0 }
 0x2ab   :  { %v1683_v6 = vadd.f32 %v3800_v57, %v1682_v3 }
 0x2ac   :  { %1995 = vst.msk [vmem:[%s4129_s7 + $0x18] sm:$0xff] %vm1991_vm3, %v1688_v2 }
 0x2ad   :  { %1994 = vst.msk [vmem:[%s4129_s7 + $0x10] sm:$0xff] %vm1991_vm3, %v1683_v6  ;;  %v2701_v7 = vpop.f32.mrb[36].mxu0 }
 0x2ae   :  { %v1698_v8 = vadd.f32 %v2701_v7, %v3800_v57  ;;  %v1692_v10 = vpop.f32.mrb[37].mxu0 }
 0x2af   :  { %v1693_v11 = vadd.f32 %v3800_v57, %v1692_v10 }
 0x2b0   :  { %1997 = vst.msk [vmem:[%s4129_s7 + $0x28] sm:$0xff] %vm1991_vm3, %v1698_v8 }
 0x2b1   :  { %1996 = vst.msk [vmem:[%s4129_s7 + $0x20] sm:$0xff] %vm1991_vm3, %v1693_v11  ;;  %v2704_v13 = vpop.f32.mrb[38].mxu0 }
 0x2b2   :  { %v1708_v14 = vadd.f32 %v2704_v13, %v3800_v57  ;;  %v1702_v16 = vpop.f32.mrb[39].mxu0 }
 0x2b3   :  { %v1703_v19 = vadd.f32 %v3800_v57, %v1702_v16 }
 0x2b4   :  { %1999 = vst.msk [vmem:[%s4129_s7 + $0x38] sm:$0xff] %vm1991_vm3, %v1708_v14 }
 0x2b5   :  { %1998 = vst.msk [vmem:[%s4129_s7 + $0x30] sm:$0xff] %vm1991_vm3, %v1703_v19  ;;  %v2707_v21 = vpop.f32.mrb[40].mxu0 }
 0x2b6   :  { %v1718_v26 = vadd.f32 %v2707_v21, %v3800_v57  ;;  %v1712_v22 = vpop.f32.mrb[41].mxu0 }
 0x2b7   :  { %v1713_v23 = vadd.f32 %v3800_v57, %v1712_v22 }
 0x2b8   :  { %2001 = vst.msk [vmem:[%s4129_s7 + $0x48] sm:$0xff] %vm1991_vm3, %v1718_v26 }
 0x2b9   :  { %2000 = vst.msk [vmem:[%s4129_s7 + $0x40] sm:$0xff] %vm1991_vm3, %v1713_v23  ;;  %v2710_v24 = vpop.f32.mrb[42].mxu0 }
 0x2ba   :  { %v1728_v29 = vadd.f32 %v2710_v24, %v3800_v57  ;;  %v1722_v30 = vpop.f32.mrb[43].mxu0 }
 0x2bb   :  { %v1723_v31 = vadd.f32 %v3800_v57, %v1722_v30 }
 0x2bc   :  { %2003 = vst.msk [vmem:[%s4129_s7 + $0x58] sm:$0xff] %vm1991_vm3, %v1728_v29 }
 0x2bd   :  { %2002 = vst.msk [vmem:[%s4129_s7 + $0x50] sm:$0xff] %vm1991_vm3, %v1723_v31  ;;  %v2713_v35 = vpop.f32.mrb[44].mxu0 }
 0x2be   :  { %v1738_v37 = vadd.f32 %v2713_v35, %v3800_v57  ;;  %v1732_v18 = vpop.f32.mrb[45].mxu0 }
 0x2bf   :  { %v1733_v38 = vadd.f32 %v3800_v57, %v1732_v18 }
 0x2c0   :  { %2005 = vst.msk [vmem:[%s4129_s7 + $0x68] sm:$0xff] %vm1991_vm3, %v1738_v37 }
 0x2c1   :  { %2004 = vst.msk [vmem:[%s4129_s7 + $0x60] sm:$0xff] %vm1991_vm3, %v1733_v38  ;;  %v2716_v39 = vpop.f32.mrb[46].mxu0 }
 0x2c2   :  { %v1748_v25 = vadd.f32 %v2716_v39, %v3800_v57  ;;  %v1742_v36 = vpop.f32.mrb[47].mxu0 }
 0x2c3   :  { %v1743_v32 = vadd.f32 %v3800_v57, %v1742_v36 }
 0x2c4   :  { %2007 = vst.msk [vmem:[%s4129_s7 + $0x78] sm:$0xff] %vm1991_vm3, %v1748_v25 }
 0x2c5   :  { %2006 = vst.msk [vmem:[%s4129_s7 + $0x70] sm:$0xff] %vm1991_vm3, %v1743_v32  ;;  %v2719_v44 = vpop.f32.mrb[48].mxu0 }
 0x2c6   :  { %v1758_v40 = vadd.f32 %v2719_v44, %v3800_v57  ;;  %v1752_v62 = vpop.f32.mrb[49].mxu0 }
 0x2c7   :  { %v1753_v58 = vadd.f32 %v3800_v57, %v1752_v62 }
 0x2c8   :  { %2009 = vst.msk [vmem:[%s4129_s7 + $0x88] sm:$0xff] %vm1991_vm3, %v1758_v40 }
 0x2c9   :  { %2008 = vst.msk [vmem:[%s4129_s7 + $0x80] sm:$0xff] %vm1991_vm3, %v1753_v58  ;;  %v2722_v9 = vpop.f32.mrb[50].mxu0 }
 0x2ca   :  { %v1768_v5 = vadd.f32 %v2722_v9, %v3800_v57  ;;  %v1762_v20 = vpop.f32.mrb[51].mxu0 }
 0x2cb   :  { %v1763_v15 = vadd.f32 %v3800_v57, %v1762_v20 }
 0x2cc   :  { %2011 = vst.msk [vmem:[%s4129_s7 + $0x98] sm:$0xff] %vm1991_vm3, %v1768_v5 }
 0x2cd   :  { %2010 = vst.msk [vmem:[%s4129_s7 + $0x90] sm:$0xff] %vm1991_vm3, %v1763_v15  ;;  %v2725_v33 = vpop.f32.mrb[52].mxu0 }
 0x2ce   :  { %v1778_v28 = vadd.f32 %v2725_v33, %v3800_v57  ;;  %v1772_v46 = vpop.f32.mrb[53].mxu0 }
 0x2cf   :  { %v1773_v41 = vadd.f32 %v3800_v57, %v1772_v46 }
 0x2d0   :  { %2013 = vst.msk [vmem:[%s4129_s7 + $0xa8] sm:$0xff] %vm1991_vm3, %v1778_v28 }
 0x2d1   :  { %2012 = vst.msk [vmem:[%s4129_s7 + $0xa0] sm:$0xff] %vm1991_vm3, %v1773_v41  ;;  %v2728_v56 = vpop.f32.mrb[54].mxu0 }
 0x2d2   :  { %v1788_v52 = vadd.f32 %v2728_v56, %v3800_v57  ;;  %v1782_v4 = vpop.f32.mrb[55].mxu0 }
 0x2d3   :  { %v1783_v0 = vadd.f32 %v3800_v57, %v1782_v4 }
 0x2d4   :  { %2015 = vst.msk [vmem:[%s4129_s7 + $0xb8] sm:$0xff] %vm1991_vm3, %v1788_v52 }
 0x2d5   :  { %2014 = vst.msk [vmem:[%s4129_s7 + $0xb0] sm:$0xff] %vm1991_vm3, %v1783_v0  ;;  %v2731_v17 = vpop.f32.mrb[56].mxu0 }
 0x2d6   :  { %v1798_v12 = vadd.f32 %v2731_v17, %v3800_v57  ;;  %v1792_v34 = vpop.f32.mrb[57].mxu0 }
 0x2d7   :  { %v1793_v27 = vadd.f32 %v3800_v57, %v1792_v34 }
 0x2d8   :  { %2017 = vst.msk [vmem:[%s4129_s7 + $0xc8] sm:$0xff] %vm1991_vm3, %v1798_v12 }
 0x2d9   :  { %2016 = vst.msk [vmem:[%s4129_s7 + $0xc0] sm:$0xff] %vm1991_vm3, %v1793_v27  ;;  %v2734_v42 = vpop.f32.mrb[58].mxu0 }
 0x2da   :  { %v1808_v43 = vadd.f32 %v2734_v42, %v3800_v57  ;;  %v1802_v45 = vpop.f32.mrb[59].mxu0 }
 0x2db   :  { %v1803_v47 = vadd.f32 %v3800_v57, %v1802_v45 }
 0x2dc   :  { %2019 = vst.msk [vmem:[%s4129_s7 + $0xd8] sm:$0xff] %vm1991_vm3, %v1808_v43 }
 0x2dd   :  { %2018 = vst.msk [vmem:[%s4129_s7 + $0xd0] sm:$0xff] %vm1991_vm3, %v1803_v47  ;;  %v2737_v48 = vpop.f32.mrb[60].mxu0 }
 0x2de   :  { %v1818_v49 = vadd.f32 %v2737_v48, %v3800_v57  ;;  %v1812_v50 = vpop.f32.mrb[61].mxu0 }
 0x2df   :  { %v1813_v51 = vadd.f32 %v3800_v57, %v1812_v50 }
 0x2e0   :  { %2021 = vst.msk [vmem:[%s4129_s7 + $0xe8] sm:$0xff] %vm1991_vm3, %v1818_v49 }
 0x2e1   :  { %2020 = vst.msk [vmem:[%s4129_s7 + $0xe0] sm:$0xff] %vm1991_vm3, %v1813_v51  ;;  %v2740_v54 = vpop.f32.mrb[62].mxu0 }
 0x2e2   :  { %v1828_v53 = vadd.f32 %v2740_v54, %v3800_v57  ;;  %v1822_v55 = vpop.f32.mrb[63].mxu0 }
 0x2e3   :  { %v1823_v59 = vadd.f32 %v3800_v57, %v1822_v55 }
 0x2e4   :  { %2023 = vst.msk [vmem:[%s4129_s7 + $0xf8] sm:$0xff] %vm1991_vm3, %v1828_v53 }
 0x2e5   :  { %2022 = vst.msk [vmem:[%s4129_s7 + $0xf0] sm:$0xff] %vm1991_vm3, %v1823_v59  ;;  %v2743_v60 = vpop.f32.mrb[64].mxu0 }
 0x2e6   :  { %v1838_v61 = vadd.f32 %v2743_v60, %v3800_v57  ;;  %v1832_v63 = vpop.f32.mrb[65].mxu0 }
 0x2e7   :  { %v1833_v1 = vadd.f32 %v3800_v57, %v1832_v63 }
 0x2e8   :  { %2025 = vst.msk [vmem:[%s4129_s7 + $0x108] sm:$0xff] %vm1991_vm3, %v1838_v61 }
 0x2e9   :  { %2024 = vst.msk [vmem:[%s4129_s7 + $0x100] sm:$0xff] %vm1991_vm3, %v1833_v1  ;;  %v2746_v2 = vpop.f32.mrb[66].mxu0 }
 0x2ea   :  { %v1848_v3 = vadd.f32 %v2746_v2, %v3800_v57  ;;  %v1842_v6 = vpop.f32.mrb[67].mxu0 }
 0x2eb   :  { %v1843_v7 = vadd.f32 %v3800_v57, %v1842_v6 }
 0x2ec   :  { %2027 = vst.msk [vmem:[%s4129_s7 + $0x118] sm:$0xff] %vm1991_vm3, %v1848_v3 }
 0x2ed   :  { %2026 = vst.msk [vmem:[%s4129_s7 + $0x110] sm:$0xff] %vm1991_vm3, %v1843_v7  ;;  %v2749_v8 = vpop.f32.mrb[68].mxu0 }
 0x2ee   :  { %v1858_v10 = vadd.f32 %v2749_v8, %v3800_v57  ;;  %v1852_v11 = vpop.f32.mrb[69].mxu0 }
 0x2ef   :  { %v1853_v13 = vadd.f32 %v3800_v57, %v1852_v11 }
 0x2f0   :  { %2029 = vst.msk [vmem:[%s4129_s7 + $0x128] sm:$0xff] %vm1991_vm3, %v1858_v10 }
 0x2f1   :  { %2028 = vst.msk [vmem:[%s4129_s7 + $0x120] sm:$0xff] %vm1991_vm3, %v1853_v13  ;;  %v2752_v14 = vpop.f32.mrb[70].mxu0 }
 0x2f2   :  { %v1868_v16 = vadd.f32 %v2752_v14, %v3800_v57  ;;  %v1862_v19 = vpop.f32.mrb[71].mxu0 }
 0x2f3   :  { %v1863_v21 = vadd.f32 %v3800_v57, %v1862_v19 }
 0x2f4   :  { %2031 = vst.msk [vmem:[%s4129_s7 + $0x138] sm:$0xff] %vm1991_vm3, %v1868_v16 }
 0x2f5   :  { %2030 = vst.msk [vmem:[%s4129_s7 + $0x130] sm:$0xff] %vm1991_vm3, %v1863_v21  ;;  %v2755_v26 = vpop.f32.mrb[72].mxu0 }
 0x2f6   :  { %v1878_v22 = vadd.f32 %v2755_v26, %v3800_v57  ;;  %v1872_v23 = vpop.f32.mrb[73].mxu0 }
 0x2f7   :  { %v1873_v24 = vadd.f32 %v3800_v57, %v1872_v23 }
 0x2f8   :  { %2033 = vst.msk [vmem:[%s4129_s7 + $0x148] sm:$0xff] %vm1991_vm3, %v1878_v22 }
 0x2f9   :  { %2032 = vst.msk [vmem:[%s4129_s7 + $0x140] sm:$0xff] %vm1991_vm3, %v1873_v24  ;;  %v2758_v29 = vpop.f32.mrb[74].mxu0 }
 0x2fa   :  { %v1888_v30 = vadd.f32 %v2758_v29, %v3800_v57  ;;  %v1882_v31 = vpop.f32.mrb[75].mxu0 }
 0x2fb   :  { %v1883_v35 = vadd.f32 %v3800_v57, %v1882_v31 }
 0x2fc   :  { %2035 = vst.msk [vmem:[%s4129_s7 + $0x158] sm:$0xff] %vm1991_vm3, %v1888_v30 }
 0x2fd   :  { %2034 = vst.msk [vmem:[%s4129_s7 + $0x150] sm:$0xff] %vm1991_vm3, %v1883_v35  ;;  %v2761_v37 = vpop.f32.mrb[76].mxu0 }
 0x2fe   :  { %v1898_v18 = vadd.f32 %v2761_v37, %v3800_v57  ;;  %v1892_v38 = vpop.f32.mrb[77].mxu0 }
 0x2ff   :  { %v1893_v39 = vadd.f32 %v3800_v57, %v1892_v38 }
 0x300   :  { %2037 = vst.msk [vmem:[%s4129_s7 + $0x168] sm:$0xff] %vm1991_vm3, %v1898_v18 }
 0x301   :  { %2036 = vst.msk [vmem:[%s4129_s7 + $0x160] sm:$0xff] %vm1991_vm3, %v1893_v39  ;;  %v2764_v25 = vpop.f32.mrb[78].mxu0 }
 0x302   :  { %v1908_v36 = vadd.f32 %v2764_v25, %v3800_v57  ;;  %v1902_v32 = vpop.f32.mrb[79].mxu0 }
 0x303   :  { %v1903_v44 = vadd.f32 %v3800_v57, %v1902_v32 }
 0x304   :  { %2039 = vst.msk [vmem:[%s4129_s7 + $0x178] sm:$0xff] %vm1991_vm3, %v1908_v36 }
 0x305   :  { %2038 = vst.msk [vmem:[%s4129_s7 + $0x170] sm:$0xff] %vm1991_vm3, %v1903_v44  ;;  %v2767_v40 = vpop.f32.mrb[80].mxu0 }
 0x306   :  { %v1918_v62 = vadd.f32 %v2767_v40, %v3800_v57  ;;  %v1912_v58 = vpop.f32.mrb[81].mxu0 }
 0x307   :  { %v1913_v9 = vadd.f32 %v3800_v57, %v1912_v58 }
 0x308   :  { %2041 = vst.msk [vmem:[%s4129_s7 + $0x188] sm:$0xff] %vm1991_vm3, %v1918_v62 }
 0x309   :  { %2040 = vst.msk [vmem:[%s4129_s7 + $0x180] sm:$0xff] %vm1991_vm3, %v1913_v9  ;;  %v2770_v5 = vpop.f32.mrb[82].mxu0 }
 0x30a   :  { %v1928_v20 = vadd.f32 %v2770_v5, %v3800_v57  ;;  %v1922_v15 = vpop.f32.mrb[83].mxu0 }
 0x30b   :  { %v1923_v33 = vadd.f32 %v3800_v57, %v1922_v15 }
 0x30c   :  { %2043 = vst.msk [vmem:[%s4129_s7 + $0x198] sm:$0xff] %vm1991_vm3, %v1928_v20 }
 0x30d   :  { %2042 = vst.msk [vmem:[%s4129_s7 + $0x190] sm:$0xff] %vm1991_vm3, %v1923_v33  ;;  %v2773_v28 = vpop.f32.mrb[84].mxu0 }
 0x30e   :  { %v1938_v46 = vadd.f32 %v2773_v28, %v3800_v57  ;;  %v1932_v41 = vpop.f32.mrb[85].mxu0 }
 0x30f   :  { %v1933_v56 = vadd.f32 %v3800_v57, %v1932_v41 }
 0x310   :  { %2045 = vst.msk [vmem:[%s4129_s7 + $0x1a8] sm:$0xff] %vm1991_vm3, %v1938_v46 }
 0x311   :  { %2044 = vst.msk [vmem:[%s4129_s7 + $0x1a0] sm:$0xff] %vm1991_vm3, %v1933_v56  ;;  %v2776_v52 = vpop.f32.mrb[86].mxu0 }
 0x312   :  { %v1948_v4 = vadd.f32 %v2776_v52, %v3800_v57  ;;  %v1942_v0 = vpop.f32.mrb[87].mxu0 }
 0x313   :  { %v1943_v17 = vadd.f32 %v3800_v57, %v1942_v0 }
 0x314   :  { %2047 = vst.msk [vmem:[%s4129_s7 + $0x1b8] sm:$0xff] %vm1991_vm3, %v1948_v4 }
 0x315   :  { %2046 = vst.msk [vmem:[%s4129_s7 + $0x1b0] sm:$0xff] %vm1991_vm3, %v1943_v17  ;;  %v2779_v12 = vpop.f32.mrb[88].mxu0 }
 0x316   :  { %v1958_v34 = vadd.f32 %v2779_v12, %v3800_v57  ;;  %v1952_v27 = vpop.f32.mrb[89].mxu0 }
 0x317   :  { %v1953_v42 = vadd.f32 %v3800_v57, %v1952_v27 }
 0x318   :  { %2049 = vst.msk [vmem:[%s4129_s7 + $0x1c8] sm:$0xff] %vm1991_vm3, %v1958_v34 }
 0x319   :  { %2048 = vst.msk [vmem:[%s4129_s7 + $0x1c0] sm:$0xff] %vm1991_vm3, %v1953_v42  ;;  %v2782_v43 = vpop.f32.mrb[90].mxu0 }
 0x31a   :  { %v1968_v45 = vadd.f32 %v2782_v43, %v3800_v57  ;;  %v1962_v47 = vpop.f32.mrb[91].mxu0 }
 0x31b   :  { %v1963_v48 = vadd.f32 %v3800_v57, %v1962_v47 }
 0x31c   :  { %2051 = vst.msk [vmem:[%s4129_s7 + $0x1d8] sm:$0xff] %vm1991_vm3, %v1968_v45 }
 0x31d   :  { %2050 = vst.msk [vmem:[%s4129_s7 + $0x1d0] sm:$0xff] %vm1991_vm3, %v1963_v48  ;;  %v2785_v49 = vpop.f32.mrb[92].mxu0 }
 0x31e   :  { %v1978_v50 = vadd.f32 %v2785_v49, %v3800_v57  ;;  %v1972_v51 = vpop.f32.mrb[93].mxu0 }
 0x31f   :  { %v1973_v54 = vadd.f32 %v3800_v57, %v1972_v51 }
 0x320   :  { %2053 = vst.msk [vmem:[%s4129_s7 + $0x1e8] sm:$0xff] %vm1991_vm3, %v1978_v50 }
 0x321   :  { %2052 = vst.msk [vmem:[%s4129_s7 + $0x1e0] sm:$0xff] %vm1991_vm3, %v1973_v54  ;;  %v2788_v53 = vpop.f32.mrb[94].mxu0 }
 0x322   :  { %v1988_v55 = vadd.f32 %v2788_v53, %v3800_v57  ;;  %v1982_v59 = vpop.f32.mrb[95].mxu0 }
 0x323   :  { %v1983_v60 = vadd.f32 %v3800_v57, %v1982_v59 }
 0x324   :  { %2055 = vst.msk [vmem:[%s4129_s7 + $0x1f8] sm:$0xff] %vm1991_vm3, %v1988_v55 }
 0x325   :  { %2054 = vst.msk [vmem:[%s4129_s7 + $0x1f0] sm:$0xff] %vm1991_vm3, %v1983_v60 }

</bundles_post_ra>
